<compile_context>
chip_gen: v7x
topology: tpu7x:2x2x1
jax: 0.10.0
libtpu: 0.0.40
codegen_flags: <defaults>
</compile_context>

<pallas_src>
import functools

import jax
import jax.numpy as jnp
from jax import lax
from jax.experimental import pallas as pl
from jax.experimental.pallas import tpu as pltpu

FEATURES = [
    'mention_tfidf', 'cand_token_cnt', 'mention_token_cnt', 'page_tfidf',
    'page_token_cnt', 'str_sim', 'prior', 'times_mentioned',
    'mention_wiki2vec_dot', 'page_wiki2vec_dot', 'mention_wiki2vec_dot_unit',
    'page_wiki2vec_dot_unit', 'candidate_tfidf_norm'
]
NUM_FEATURES = len(FEATURES)  # 13


def _num_tensorcores():
    """Best-effort TensorCore-per-chip count (v7x = 2, v5e/v6e = 1)."""
    try:
        d = jax.devices()[0]
        nc = getattr(d, "num_cores", None)
        if isinstance(nc, int) and nc > 0:
            return nc
        kind = str(getattr(d, "device_kind", "")).lower()
        if "v7" in kind:
            return 2
    except Exception:
        pass
    return 1


def _mlp_skips_kernel(*refs, num_hidden, chunk_n, tanh_final_layer,
                      matmul_dtype):
    NH = num_hidden
    n_params = NH + 2
    x_ref = refs[0]                                  # (F, block_n) matmul_dtype
    w_refs = refs[1:1 + n_params]
    b_refs = refs[1 + n_params:1 + 2 * n_params]
    o_ref = refs[-1]                                 # (1, block_n) f32

    # Hoist tiny resident params out of the chunk loop (live across the body).
    w0 = w_refs[0][...]                              # (H, F)   matmul dtype
    w_hid = [w_refs[i][...] for i in range(1, NH + 1)]   # (H, H) matmul dtype
    w_out = w_refs[NH + 1][...]                      # (H, 1)   f32 (VPU path)
    b0 = b_refs[0][...]                              # (H, 1)   f32
    b_hid = [b_refs[i][...] for i in range(1, NH + 1)]
    b_out = b_refs[NH + 1][...]                      # (1, 1)   f32

    block_n = x_ref.shape[1]
    n_chunks = block_n // chunk_n                    # static

    def chunk_body(c, carry):
        start = pl.multiple_of(c * chunk_n, chunk_n)
        x = x_ref[:, pl.ds(start, chunk_n)]          # (F, chunk)

        # Input layer: h = relu(W_in^T x + b_in)     -> (H, chunk) f32
        h = jnp.dot(w0, x, preferred_element_type=jnp.float32)
        h = jnp.maximum(h + b0, 0.0)

        # Hidden residual blocks: h = relu(W_i^T h + b_i) + h
        for i in range(NH):
            z = jnp.dot(w_hid[i], h.astype(matmul_dtype),
                        preferred_element_type=jnp.float32)
            h = jnp.maximum(z + b_hid[i], 0.0) + h

        # Output layer as VPU multiply + sublane reduction (avoids a
        # 1-lane-wide MXU pass; store stays a full-lane unmasked vst).
        y = jnp.sum(h * w_out, axis=0, keepdims=True) + b_out   # (1, chunk)
        if tanh_final_layer:
            y = jnp.tanh(y)
        o_ref[:, pl.ds(start, chunk_n)] = y.astype(o_ref.dtype)
        return carry

    # Unrolled inner loop over lane chunks: amortizes the per-grid-step cost of
    # a big block while keeping per-chunk live ranges within the vreg file.
    lax.fori_loop(0, n_chunks, chunk_body, 0, unroll=True)


def _prep_params(weights, biases, matmul_dtype):
    """Pre-transpose/cast each weight & bias; each stays its own tiny array."""
    F, H = weights[0].shape
    NH = len(weights) - 2
    w_list = [jnp.asarray(weights[0], jnp.float32).T.astype(matmul_dtype)]
    for i in range(1, NH + 1):
        w_list.append(jnp.asarray(weights[i], jnp.float32).T.astype(matmul_dtype))
    w_list.append(jnp.asarray(weights[-1], jnp.float32).reshape(H, 1))  # f32
    b_list = [jnp.asarray(biases[i], jnp.float32).reshape(-1, 1)
              for i in range(NH + 1)]
    b_list.append(jnp.asarray(biases[-1], jnp.float32).reshape(1, 1))
    return w_list, b_list


def ltr_bow_skips_mlp_forward(x, weights, biases, *, tanh_final_layer=False,
                              block_n=8192, chunk_n=256,
                              matmul_dtype=jnp.bfloat16, x_transposed=False):
    """Fused MLPSkips forward.

    x: [N, 13] (or [13, N] if x_transposed=True, which skips the wrapper-side
    transpose copy entirely).  Returns [N] float32.
    """
    if x_transposed:
        F, N = x.shape
        xt = x.astype(matmul_dtype)
    else:
        N, F = x.shape
        # Cast to the (bf16) wire format BEFORE transposing: halves the one
        # wrapper-side HBM copy.  Producers should pass [13, N] directly.
        xt = x.astype(matmul_dtype).T

    num_layers = len(weights)
    assert num_layers >= 2 and len(biases) == num_layers
    H = weights[0].shape[1]
    NH = num_layers - 2
    assert weights[0].shape == (F, H)
    for i in range(1, NH + 1):
        assert weights[i].shape == (H, H)
    assert weights[-1].shape == (H, 1)

    # ---- tile sizing -------------------------------------------------------
    chunk_n = max(128, (chunk_n // 128) * 128)
    n_cores = _num_tensorcores()
    # Cover N with as few (big) steps as possible; only force >=2 steps on
    # multi-TensorCore chips (v7x) so both cores get work.  v5e/v6e (1 TC) run
    # small N as a single block (an extra step there is pure overhead).
    block_cap = 128 * pl.cdiv(N, 128)
    if n_cores > 1:
        block_cap = min(block_cap, 128 * pl.cdiv(pl.cdiv(N, n_cores), 128))
    block_n = max(128, min(block_n, block_cap))
    chunk_n = min(chunk_n, block_n)
    block_n = chunk_n * pl.cdiv(block_n, chunk_n)    # multiple of chunk_n
    grid_n = pl.cdiv(N, block_n)
    assert block_n % chunk_n == 0 and block_n % 128 == 0

    w_list, b_list = _prep_params(weights, biases, matmul_dtype)
    params = w_list + b_list

    kernel = functools.partial(
        _mlp_skips_kernel, num_hidden=NH, chunk_n=chunk_n,
        tanh_final_layer=tanh_final_layer, matmul_dtype=matmul_dtype)

    flops = 2 * N * (F * H + NH * H * H + H)
    bytes_accessed = (N * F * jnp.dtype(matmul_dtype).itemsize
                      + sum(int(p.size) * p.dtype.itemsize for p in params)
                      + N * 4)
    cost = pl.CostEstimate(flops=flops,
                           transcendentals=N if tanh_final_layer else 0,
                           bytes_accessed=bytes_accessed)

    # No explicit padding: grid covers N with a partial last block.  The tail
    # of the last x tile is stale VMEM; each output lane depends only on its
    # own input lane, and writes past N are clipped on writeback, so any
    # garbage stays confined to discarded lanes.
    in_specs = [pl.BlockSpec((F, block_n), lambda i: (0, i))]          # x^T
    in_specs += [pl.BlockSpec(p.shape, lambda i: (0, 0)) for p in params]

    out = pl.pallas_call(
        kernel,
        out_shape=jax.ShapeDtypeStruct((1, N), jnp.float32),
        grid_spec=pltpu.PrefetchScalarGridSpec(
            num_scalar_prefetch=0,
            grid=(grid_n,),
            in_specs=in_specs,
            out_specs=pl.BlockSpec((1, block_n), lambda i: (0, i)),
        ),
        compiler_params=pltpu.CompilerParams(
            dimension_semantics=("parallel",)),
        cost_estimate=cost,
    )(xt, *params)

    return out.reshape(-1)


def init_params(key, num_features, hidden_size, num_hidden):
    """Deterministic synthetic params: 13 -> H (x num_hidden residual) -> 1."""
    dims = ([(num_features, hidden_size)]
            + [(hidden_size, hidden_size)] * num_hidden
            + [(hidden_size, 1)])
    weights, biases = [], []
    for din, dout in dims:
        key, kw, kb = jax.random.split(key, 3)
        scale = 1.0 / jnp.sqrt(jnp.float32(din))
        weights.append(jax.random.uniform(kw, (din, dout), jnp.float32,
                                          minval=-scale, maxval=scale))
        biases.append(jax.random.uniform(kb, (dout,), jnp.float32,
                                         minval=-scale, maxval=scale))
    return weights, biases


def reference_forward(x, weights, biases, tanh_final_layer=False,
                      matmul_dtype=jnp.float32):
    """Pure-JAX reference; optionally mimics the bf16-matmul/f32-accumulate path."""
    hp = jax.lax.Precision.HIGHEST
    cast = lambda a: a.astype(matmul_dtype)
    h = jnp.maximum(
        jnp.dot(cast(x), cast(weights[0]), precision=hp,
                preferred_element_type=jnp.float32) + biases[0], 0.0)
    for i in range(1, len(weights) - 1):
        z = jnp.dot(cast(h), cast(weights[i]), precision=hp,
                    preferred_element_type=jnp.float32)
        h = jnp.maximum(z + biases[i], 0.0) + h
    y = jnp.dot(h, weights[-1], precision=hp,
                preferred_element_type=jnp.float32) + biases[-1]
    if tanh_final_layer:
        y = jnp.tanh(y)
    return y.reshape(-1)


if __name__ == "__main__":
    key = jax.random.PRNGKey(0)
    hidden_size, num_hidden = 32, 2
    N = 1000   # non-multiple of 128: exercises the partial last block

    key, kx = jax.random.split(key)
    x = jax.random.normal(kx, (N, NUM_FEATURES), jnp.float32)
    weights, biases = init_params(key, NUM_FEATURES, hidden_size, num_hidden)

    # Exact-math path (f32 matmuls) vs f32 reference.
    out = jax.block_until_ready(
        ltr_bow_skips_mlp_forward(x, weights, biases,
                                  matmul_dtype=jnp.float32))
    ref = reference_forward(x, weights, biases)
    assert out.shape == (N,)
    assert jnp.allclose(out, ref, atol=1e-4, rtol=1e-4), "f32 mismatch"

    # tanh_final_layer path (f32 matmuls).
    out_t = jax.block_until_ready(
        ltr_bow_skips_mlp_forward(x, weights, biases, tanh_final_layer=True,
                                  matmul_dtype=jnp.float32))
    ref_t = reference_forward(x, weights, biases, tanh_final_layer=True)
    assert jnp.allclose(out_t, ref_t, atol=1e-4, rtol=1e-4), "tanh mismatch"

    # Default path: bf16 wire format + bf16 MXU matmuls (f32 accumulate),
    # checked against a reference that applies the same bf16 casts.
    out_b = jax.block_until_ready(
        ltr_bow_skips_mlp_forward(x, weights, biases))
    ref_b = reference_forward(x, weights, biases,
                              matmul_dtype=jnp.bfloat16)
    assert jnp.allclose(out_b, ref_b, atol=2e-3, rtol=2e-3), "bf16 mismatch"
    assert jnp.allclose(out_b, ref, atol=1.5e-1, rtol=1.5e-1), "bf16 sanity"

    print("KERNEL_OK")
</pallas_src>

<mosaic_0001>
module attributes {stable_mosaic.version = 11 : i64} {
  func.func @_mlp_skips_kernel(%arg0: i32, %arg1: memref<13x1024xf32, #tpu.memory_space<vmem>>, %arg2: memref<32x13xf32, #tpu.memory_space<vmem>>, %arg3: memref<32x32xf32, #tpu.memory_space<vmem>>, %arg4: memref<32x32xf32, #tpu.memory_space<vmem>>, %arg5: memref<32x1xf32, #tpu.memory_space<vmem>>, %arg6: memref<32x1xf32, #tpu.memory_space<vmem>>, %arg7: memref<32x1xf32, #tpu.memory_space<vmem>>, %arg8: memref<32x1xf32, #tpu.memory_space<vmem>>, %arg9: memref<1x1xf32, #tpu.memory_space<vmem>>, %arg10: memref<1x1024xf32, #tpu.memory_space<vmem>>) attributes {dimension_semantics = [#tpu.dimension_semantics<parallel>], iteration_bounds = array<i64: 1>, scalar_prefetch = 0 : i64, scratch_operands = 0 : i64, tpu.core_type = #tpu.core_type<tc>, window_params = [{transform_indices = @transform_0, window_bounds = array<i64: 13, 1024>}, {pipeline_mode = #tpu.pipeline_mode<synchronous>, transform_indices = @transform_1, window_bounds = array<i64: 32, 13>}, {pipeline_mode = #tpu.pipeline_mode<synchronous>, transform_indices = @transform_2, window_bounds = array<i64: 32, 32>}, {pipeline_mode = #tpu.pipeline_mode<synchronous>, transform_indices = @transform_3, window_bounds = array<i64: 32, 32>}, {pipeline_mode = #tpu.pipeline_mode<synchronous>, transform_indices = @transform_4, window_bounds = array<i64: 32, 1>}, {pipeline_mode = #tpu.pipeline_mode<synchronous>, transform_indices = @transform_5, window_bounds = array<i64: 32, 1>}, {pipeline_mode = #tpu.pipeline_mode<synchronous>, transform_indices = @transform_6, window_bounds = array<i64: 32, 1>}, {pipeline_mode = #tpu.pipeline_mode<synchronous>, transform_indices = @transform_7, window_bounds = array<i64: 32, 1>}, {pipeline_mode = #tpu.pipeline_mode<synchronous>, transform_indices = @transform_8, window_bounds = array<i64: 1, 1>}, {transform_indices = @transform_9, window_bounds = array<i64: 1, 1024>}]} {
    %c0 = arith.constant 0 : index
    %c0_0 = arith.constant 0 : index
    %0 = vector.load %arg2[%c0, %c0_0] : memref<32x13xf32, #tpu.memory_space<vmem>>, vector<32x13xf32>
    %c0_1 = arith.constant 0 : index
    %c0_2 = arith.constant 0 : index
    %1 = vector.load %arg3[%c0_1, %c0_2] : memref<32x32xf32, #tpu.memory_space<vmem>>, vector<32x32xf32>
    %c0_3 = arith.constant 0 : index
    %c0_4 = arith.constant 0 : index
    %2 = vector.load %arg4[%c0_3, %c0_4] : memref<32x32xf32, #tpu.memory_space<vmem>>, vector<32x32xf32>
    %c0_5 = arith.constant 0 : index
    %c0_6 = arith.constant 0 : index
    %3 = vector.load %arg5[%c0_5, %c0_6] : memref<32x1xf32, #tpu.memory_space<vmem>>, vector<32x1xf32>
    %c0_7 = arith.constant 0 : index
    %c0_8 = arith.constant 0 : index
    %4 = vector.load %arg6[%c0_7, %c0_8] : memref<32x1xf32, #tpu.memory_space<vmem>>, vector<32x1xf32>
    %c0_9 = arith.constant 0 : index
    %c0_10 = arith.constant 0 : index
    %5 = vector.load %arg7[%c0_9, %c0_10] : memref<32x1xf32, #tpu.memory_space<vmem>>, vector<32x1xf32>
    %c0_11 = arith.constant 0 : index
    %c0_12 = arith.constant 0 : index
    %6 = vector.load %arg8[%c0_11, %c0_12] : memref<32x1xf32, #tpu.memory_space<vmem>>, vector<32x1xf32>
    %c0_13 = arith.constant 0 : index
    %c0_14 = arith.constant 0 : index
    %7 = vector.load %arg9[%c0_13, %c0_14] : memref<1x1xf32, #tpu.memory_space<vmem>>, vector<1x1xf32>
    %c0_i32 = arith.constant 0 : i32
    %c256_i32 = arith.constant 256 : i32
    %8 = arith.muli %c0_i32, %c256_i32 : i32
    %9 = tpu.assume_multiple %8, 256 : i32
    %c0_15 = arith.constant 0 : index
    %10 = arith.index_cast %9 : i32 to index
    %11 = vector.load %arg1[%c0_15, %10] : memref<13x1024xf32, #tpu.memory_space<vmem>>, vector<13x256xf32>
    %cst = arith.constant dense<0.000000e+00> : vector<32x256xf32>
    %12 = tpu.matmul %0, %11, %cst {dimension_numbers = #tpu.dot_dimension_numbers<[1], [0], [0], [1], [0, 0, 1, 1], [], []>} : vector<32x13xf32>, vector<13x256xf32>, vector<32x256xf32> -> vector<32x256xf32>
    %13 = vector.broadcast %4 : vector<32x1xf32> to vector<32x256xf32>
    %14 = arith.addf %12, %13 : vector<32x256xf32>
    %cst_16 = arith.constant 0.000000e+00 : f32
    %15 = vector.broadcast %cst_16 : f32 to vector<32x256xf32>
    %16 = arith.maximumf %14, %15 : vector<32x256xf32>
    %cst_17 = arith.constant dense<0.000000e+00> : vector<32x256xf32>
    %17 = tpu.matmul %1, %16, %cst_17 {dimension_numbers = #tpu.dot_dimension_numbers<[1], [0], [0], [1], [0, 0, 1, 1], [], []>} : vector<32x32xf32>, vector<32x256xf32>, vector<32x256xf32> -> vector<32x256xf32>
    %18 = vector.broadcast %5 : vector<32x1xf32> to vector<32x256xf32>
    %19 = arith.addf %17, %18 : vector<32x256xf32>
    %cst_18 = arith.constant 0.000000e+00 : f32
    %20 = vector.broadcast %cst_18 : f32 to vector<32x256xf32>
    %21 = arith.maximumf %19, %20 : vector<32x256xf32>
    %22 = arith.addf %21, %16 : vector<32x256xf32>
    %cst_19 = arith.constant dense<0.000000e+00> : vector<32x256xf32>
    %23 = tpu.matmul %2, %22, %cst_19 {dimension_numbers = #tpu.dot_dimension_numbers<[1], [0], [0], [1], [0, 0, 1, 1], [], []>} : vector<32x32xf32>, vector<32x256xf32>, vector<32x256xf32> -> vector<32x256xf32>
    %24 = vector.broadcast %6 : vector<32x1xf32> to vector<32x256xf32>
    %25 = arith.addf %23, %24 : vector<32x256xf32>
    %cst_20 = arith.constant 0.000000e+00 : f32
    %26 = vector.broadcast %cst_20 : f32 to vector<32x256xf32>
    %27 = arith.maximumf %25, %26 : vector<32x256xf32>
    %28 = arith.addf %27, %22 : vector<32x256xf32>
    %29 = vector.broadcast %3 : vector<32x1xf32> to vector<32x256xf32>
    %30 = arith.mulf %28, %29 : vector<32x256xf32>
    %cst_21 = arith.constant dense<0.000000e+00> : vector<256xf32>
    %31 = vector.multi_reduction <add>, %30, %cst_21 [0] : vector<32x256xf32> to vector<256xf32>
    %32 = vector.shape_cast %31 : vector<256xf32> to vector<1x256xf32>
    %33 = vector.broadcast %7 : vector<1x1xf32> to vector<1x256xf32>
    %34 = arith.addf %32, %33 : vector<1x256xf32>
    %c0_22 = arith.constant 0 : index
    %35 = arith.index_cast %9 : i32 to index
    %36 = vector.load %arg10[%c0_22, %35] : memref<1x1024xf32, #tpu.memory_space<vmem>>, vector<1x256xf32>
    tpu.vector_store %arg10[%c0_22, %35], %34 {strides = array<i32>} : memref<1x1024xf32, #tpu.memory_space<vmem>>, vector<1x256xf32>,
    %c1_i32 = arith.constant 1 : i32
    %c256_i32_23 = arith.constant 256 : i32
    %37 = arith.muli %c1_i32, %c256_i32_23 : i32
    %38 = tpu.assume_multiple %37, 256 : i32
    %c0_24 = arith.constant 0 : index
    %39 = arith.index_cast %38 : i32 to index
    %40 = vector.load %arg1[%c0_24, %39] : memref<13x1024xf32, #tpu.memory_space<vmem>>, vector<13x256xf32>
    %cst_25 = arith.constant dense<0.000000e+00> : vector<32x256xf32>
    %41 = tpu.matmul %0, %40, %cst_25 {dimension_numbers = #tpu.dot_dimension_numbers<[1], [0], [0], [1], [0, 0, 1, 1], [], []>} : vector<32x13xf32>, vector<13x256xf32>, vector<32x256xf32> -> vector<32x256xf32>
    %42 = vector.broadcast %4 : vector<32x1xf32> to vector<32x256xf32>
    %43 = arith.addf %41, %42 : vector<32x256xf32>
    %cst_26 = arith.constant 0.000000e+00 : f32
    %44 = vector.broadcast %cst_26 : f32 to vector<32x256xf32>
    %45 = arith.maximumf %43, %44 : vector<32x256xf32>
    %cst_27 = arith.constant dense<0.000000e+00> : vector<32x256xf32>
    %46 = tpu.matmul %1, %45, %cst_27 {dimension_numbers = #tpu.dot_dimension_numbers<[1], [0], [0], [1], [0, 0, 1, 1], [], []>} : vector<32x32xf32>, vector<32x256xf32>, vector<32x256xf32> -> vector<32x256xf32>
    %47 = vector.broadcast %5 : vector<32x1xf32> to vector<32x256xf32>
    %48 = arith.addf %46, %47 : vector<32x256xf32>
    %cst_28 = arith.constant 0.000000e+00 : f32
    %49 = vector.broadcast %cst_28 : f32 to vector<32x256xf32>
    %50 = arith.maximumf %48, %49 : vector<32x256xf32>
    %51 = arith.addf %50, %45 : vector<32x256xf32>
    %cst_29 = arith.constant dense<0.000000e+00> : vector<32x256xf32>
    %52 = tpu.matmul %2, %51, %cst_29 {dimension_numbers = #tpu.dot_dimension_numbers<[1], [0], [0], [1], [0, 0, 1, 1], [], []>} : vector<32x32xf32>, vector<32x256xf32>, vector<32x256xf32> -> vector<32x256xf32>
    %53 = vector.broadcast %6 : vector<32x1xf32> to vector<32x256xf32>
    %54 = arith.addf %52, %53 : vector<32x256xf32>
    %cst_30 = arith.constant 0.000000e+00 : f32
    %55 = vector.broadcast %cst_30 : f32 to vector<32x256xf32>
    %56 = arith.maximumf %54, %55 : vector<32x256xf32>
    %57 = arith.addf %56, %51 : vector<32x256xf32>
    %58 = vector.broadcast %3 : vector<32x1xf32> to vector<32x256xf32>
    %59 = arith.mulf %57, %58 : vector<32x256xf32>
    %cst_31 = arith.constant dense<0.000000e+00> : vector<256xf32>
    %60 = vector.multi_reduction <add>, %59, %cst_31 [0] : vector<32x256xf32> to vector<256xf32>
    %61 = vector.shape_cast %60 : vector<256xf32> to vector<1x256xf32>
    %62 = vector.broadcast %7 : vector<1x1xf32> to vector<1x256xf32>
    %63 = arith.addf %61, %62 : vector<1x256xf32>
    %c0_32 = arith.constant 0 : index
    %64 = arith.index_cast %38 : i32 to index
    %65 = vector.load %arg10[%c0_32, %64] : memref<1x1024xf32, #tpu.memory_space<vmem>>, vector<1x256xf32>
    tpu.vector_store %arg10[%c0_32, %64], %63 {strides = array<i32>} : memref<1x1024xf32, #tpu.memory_space<vmem>>, vector<1x256xf32>,
    %c2_i32 = arith.constant 2 : i32
    %c256_i32_33 = arith.constant 256 : i32
    %66 = arith.muli %c2_i32, %c256_i32_33 : i32
    %67 = tpu.assume_multiple %66, 256 : i32
    %c0_34 = arith.constant 0 : index
    %68 = arith.index_cast %67 : i32 to index
    %69 = vector.load %arg1[%c0_34, %68] : memref<13x1024xf32, #tpu.memory_space<vmem>>, vector<13x256xf32>
    %cst_35 = arith.constant dense<0.000000e+00> : vector<32x256xf32>
    %70 = tpu.matmul %0, %69, %cst_35 {dimension_numbers = #tpu.dot_dimension_numbers<[1], [0], [0], [1], [0, 0, 1, 1], [], []>} : vector<32x13xf32>, vector<13x256xf32>, vector<32x256xf32> -> vector<32x256xf32>
    %71 = vector.broadcast %4 : vector<32x1xf32> to vector<32x256xf32>
    %72 = arith.addf %70, %71 : vector<32x256xf32>
    %cst_36 = arith.constant 0.000000e+00 : f32
    %73 = vector.broadcast %cst_36 : f32 to vector<32x256xf32>
    %74 = arith.maximumf %72, %73 : vector<32x256xf32>
    %cst_37 = arith.constant dense<0.000000e+00> : vector<32x256xf32>
    %75 = tpu.matmul %1, %74, %cst_37 {dimension_numbers = #tpu.dot_dimension_numbers<[1], [0], [0], [1], [0, 0, 1, 1], [], []>} : vector<32x32xf32>, vector<32x256xf32>, vector<32x256xf32> -> vector<32x256xf32>
    %76 = vector.broadcast %5 : vector<32x1xf32> to vector<32x256xf32>
    %77 = arith.addf %75, %76 : vector<32x256xf32>
    %cst_38 = arith.constant 0.000000e+00 : f32
    %78 = vector.broadcast %cst_38 : f32 to vector<32x256xf32>
    %79 = arith.maximumf %77, %78 : vector<32x256xf32>
    %80 = arith.addf %79, %74 : vector<32x256xf32>
    %cst_39 = arith.constant dense<0.000000e+00> : vector<32x256xf32>
    %81 = tpu.matmul %2, %80, %cst_39 {dimension_numbers = #tpu.dot_dimension_numbers<[1], [0], [0], [1], [0, 0, 1, 1], [], []>} : vector<32x32xf32>, vector<32x256xf32>, vector<32x256xf32> -> vector<32x256xf32>
    %82 = vector.broadcast %6 : vector<32x1xf32> to vector<32x256xf32>
    %83 = arith.addf %81, %82 : vector<32x256xf32>
    %cst_40 = arith.constant 0.000000e+00 : f32
    %84 = vector.broadcast %cst_40 : f32 to vector<32x256xf32>
    %85 = arith.maximumf %83, %84 : vector<32x256xf32>
    %86 = arith.addf %85, %80 : vector<32x256xf32>
    %87 = vector.broadcast %3 : vector<32x1xf32> to vector<32x256xf32>
    %88 = arith.mulf %86, %87 : vector<32x256xf32>
    %cst_41 = arith.constant dense<0.000000e+00> : vector<256xf32>
    %89 = vector.multi_reduction <add>, %88, %cst_41 [0] : vector<32x256xf32> to vector<256xf32>
    %90 = vector.shape_cast %89 : vector<256xf32> to vector<1x256xf32>
    %91 = vector.broadcast %7 : vector<1x1xf32> to vector<1x256xf32>
    %92 = arith.addf %90, %91 : vector<1x256xf32>
    %c0_42 = arith.constant 0 : index
    %93 = arith.index_cast %67 : i32 to index
    %94 = vector.load %arg10[%c0_42, %93] : memref<1x1024xf32, #tpu.memory_space<vmem>>, vector<1x256xf32>
    tpu.vector_store %arg10[%c0_42, %93], %92 {strides = array<i32>} : memref<1x1024xf32, #tpu.memory_space<vmem>>, vector<1x256xf32>,
    %c3_i32 = arith.constant 3 : i32
    %c256_i32_43 = arith.constant 256 : i32
    %95 = arith.muli %c3_i32, %c256_i32_43 : i32
    %96 = tpu.assume_multiple %95, 256 : i32
    %c0_44 = arith.constant 0 : index
    %97 = arith.index_cast %96 : i32 to index
    %98 = vector.load %arg1[%c0_44, %97] : memref<13x1024xf32, #tpu.memory_space<vmem>>, vector<13x256xf32>
    %cst_45 = arith.constant dense<0.000000e+00> : vector<32x256xf32>
    %99 = tpu.matmul %0, %98, %cst_45 {dimension_numbers = #tpu.dot_dimension_numbers<[1], [0], [0], [1], [0, 0, 1, 1], [], []>} : vector<32x13xf32>, vector<13x256xf32>, vector<32x256xf32> -> vector<32x256xf32>
    %100 = vector.broadcast %4 : vector<32x1xf32> to vector<32x256xf32>
    %101 = arith.addf %99, %100 : vector<32x256xf32>
    %cst_46 = arith.constant 0.000000e+00 : f32
    %102 = vector.broadcast %cst_46 : f32 to vector<32x256xf32>
    %103 = arith.maximumf %101, %102 : vector<32x256xf32>
    %cst_47 = arith.constant dense<0.000000e+00> : vector<32x256xf32>
    %104 = tpu.matmul %1, %103, %cst_47 {dimension_numbers = #tpu.dot_dimension_numbers<[1], [0], [0], [1], [0, 0, 1, 1], [], []>} : vector<32x32xf32>, vector<32x256xf32>, vector<32x256xf32> -> vector<32x256xf32>
    %105 = vector.broadcast %5 : vector<32x1xf32> to vector<32x256xf32>
    %106 = arith.addf %104, %105 : vector<32x256xf32>
    %cst_48 = arith.constant 0.000000e+00 : f32
    %107 = vector.broadcast %cst_48 : f32 to vector<32x256xf32>
    %108 = arith.maximumf %106, %107 : vector<32x256xf32>
    %109 = arith.addf %108, %103 : vector<32x256xf32>
    %cst_49 = arith.constant dense<0.000000e+00> : vector<32x256xf32>
    %110 = tpu.matmul %2, %109, %cst_49 {dimension_numbers = #tpu.dot_dimension_numbers<[1], [0], [0], [1], [0, 0, 1, 1], [], []>} : vector<32x32xf32>, vector<32x256xf32>, vector<32x256xf32> -> vector<32x256xf32>
    %111 = vector.broadcast %6 : vector<32x1xf32> to vector<32x256xf32>
    %112 = arith.addf %110, %111 : vector<32x256xf32>
    %cst_50 = arith.constant 0.000000e+00 : f32
    %113 = vector.broadcast %cst_50 : f32 to vector<32x256xf32>
    %114 = arith.maximumf %112, %113 : vector<32x256xf32>
    %115 = arith.addf %114, %109 : vector<32x256xf32>
    %116 = vector.broadcast %3 : vector<32x1xf32> to vector<32x256xf32>
    %117 = arith.mulf %115, %116 : vector<32x256xf32>
    %cst_51 = arith.constant dense<0.000000e+00> : vector<256xf32>
    %118 = vector.multi_reduction <add>, %117, %cst_51 [0] : vector<32x256xf32> to vector<256xf32>
    %119 = vector.shape_cast %118 : vector<256xf32> to vector<1x256xf32>
    %120 = vector.broadcast %7 : vector<1x1xf32> to vector<1x256xf32>
    %121 = arith.addf %119, %120 : vector<1x256xf32>
    %c0_52 = arith.constant 0 : index
    %122 = arith.index_cast %96 : i32 to index
    %123 = vector.load %arg10[%c0_52, %122] : memref<1x1024xf32, #tpu.memory_space<vmem>>, vector<1x256xf32>
    tpu.vector_store %arg10[%c0_52, %122], %121 {strides = array<i32>} : memref<1x1024xf32, #tpu.memory_space<vmem>>, vector<1x256xf32>,
    %c4_i32 = arith.constant 4 : i32
    return
  }
  func.func @transform_0(%arg0: i32) -> (i32, i32) {
    %c0_i32 = arith.constant 0 : i32
    %c0_i32_0 = arith.constant 0 : i32
    return %c0_i32, %arg0 : i32, i32
  }
  func.func @transform_1(%arg0: i32) -> (i32, i32) {
    %c0_i32 = arith.constant 0 : i32
    %c0_i32_0 = arith.constant 0 : i32
    %c0_i32_1 = arith.constant 0 : i32
    return %c0_i32, %c0_i32_0 : i32, i32
  }
  func.func @transform_2(%arg0: i32) -> (i32, i32) {
    %c0_i32 = arith.constant 0 : i32
    %c0_i32_0 = arith.constant 0 : i32
    %c0_i32_1 = arith.constant 0 : i32
    return %c0_i32, %c0_i32_0 : i32, i32
  }
  func.func @transform_3(%arg0: i32) -> (i32, i32) {
    %c0_i32 = arith.constant 0 : i32
    %c0_i32_0 = arith.constant 0 : i32
    %c0_i32_1 = arith.constant 0 : i32
    return %c0_i32, %c0_i32_0 : i32, i32
  }
  func.func @transform_4(%arg0: i32) -> (i32, i32) {
    %c0_i32 = arith.constant 0 : i32
    %c0_i32_0 = arith.constant 0 : i32
    %c0_i32_1 = arith.constant 0 : i32
    return %c0_i32, %c0_i32_0 : i32, i32
  }
  func.func @transform_5(%arg0: i32) -> (i32, i32) {
    %c0_i32 = arith.constant 0 : i32
    %c0_i32_0 = arith.constant 0 : i32
    %c0_i32_1 = arith.constant 0 : i32
    return %c0_i32, %c0_i32_0 : i32, i32
  }
  func.func @transform_6(%arg0: i32) -> (i32, i32) {
    %c0_i32 = arith.constant 0 : i32
    %c0_i32_0 = arith.constant 0 : i32
    %c0_i32_1 = arith.constant 0 : i32
    return %c0_i32, %c0_i32_0 : i32, i32
  }
  func.func @transform_7(%arg0: i32) -> (i32, i32) {
    %c0_i32 = arith.constant 0 : i32
    %c0_i32_0 = arith.constant 0 : i32
    %c0_i32_1 = arith.constant 0 : i32
    return %c0_i32, %c0_i32_0 : i32, i32
  }
  func.func @transform_8(%arg0: i32) -> (i32, i32) {
    %c0_i32 = arith.constant 0 : i32
    %c0_i32_0 = arith.constant 0 : i32
    %c0_i32_1 = arith.constant 0 : i32
    return %c0_i32, %c0_i32_0 : i32, i32
  }
  func.func @transform_9(%arg0: i32) -> (i32, i32) {
    %c0_i32 = arith.constant 0 : i32
    %c0_i32_0 = arith.constant 0 : i32
    return %c0_i32, %arg0 : i32, i32
  }
}

</mosaic_0001>

<bundles_post_ra>
// kernel: tpu_custom_call.1
= control target key start
LH: loop header
LB: loop body
LE: loop exit
PB: predicated region body
PF: predicated region fallthrough
CT: control target
= control target key end

     0   :  { %s2771_s0 = inlined_call_operand.vmem [shape: f32[13,1000], index: 0, kind: input, shape index: {}]   ;;  %s2772_s1 = inlined_call_operand.vmem [shape: f32[32,13], index: 1, kind: input, shape index: {}]   ;;  %s2773_s2 = inlined_call_operand.vmem [shape: f32[32,32], index: 2, kind: input, shape index: {}]   ;;  %s2774_s3 = inlined_call_operand.vmem [shape: f32[32,32], index: 3, kind: input, shape index: {}]   ;;  %s2775_s4 = inlined_call_operand.vmem [shape: f32[32,1], index: 4, kind: input, shape index: {}]   ;;  %s2776_s5 = inlined_call_operand.vmem [shape: f32[32,1], index: 5, kind: input, shape index: {}]   ;;  %s2777_s6 = inlined_call_operand.vmem [shape: f32[32,1], index: 6, kind: input, shape index: {}]   ;;  %s2778_s7 = inlined_call_operand.vmem [shape: f32[32,1], index: 7, kind: input, shape index: {}]   ;;  %s2779_s8 = inlined_call_operand.<no memory space> [shape: f32[1,1], index: 8, kind: input, shape index: {}]   ;;  %s2780_s9 = inlined_call_operand.hbm [shape: f32[1,1000], index: 9, kind: output, shape index: {}]  }
   0x1   :  { %v14_v0 = vstv %s2779_s8 }
   0x2   :  { %15 = vst [vmem:[#allocation2] sm:$0x1] %v14_v0 }
   0x3   :  { %v65_v1 = vld [vmem:[%s2771_s0 + $0x8] sm:$0xff]  ;;  %vm101_vm0 = vcmask 1044480   ;;  %v64_v3 = vld [vmem:[%s2771_s0] sm:$0xff]  ;;  %vm1859_vm1 = vmmov 1   ;;  %v2781_v8 = vmov 0.0   ;;  %v1861_v9 = vmov 0  }
   0x4   :  { %v67_v2 = vld [vmem:[%s2771_s0 + $0x48] sm:$0x1f]  ;;  %vm1926_vm2 = vmpackc.low %vm101_vm0, %vm1859_vm1  ;;  %v66_v6 = vld [vmem:[%s2771_s0 + $0x40] sm:$0x1f]  ;;  %172 = vmatprep.mubr.f32.mxu0 %v2781_v8  ;;  %1833 = vset.pattern.permute.xlu0 %v1861_v9  ;;  %vm88_vm3 = vcmask 105472  }
   0x5   :  { %v1740_v4 = vpack.c.bf16 %v67_v2, %v65_v1  ;;  %v1743_v7 = vpack.c.bf16 %v66_v6, %v64_v3  ;;  %v51_v10 = vld [vmem:[%s2776_s5] sm:$0xff]  ;;  %1834 = vset.pattern.permute.xlu1 %v1861_v9  ;;  %v53_v11 = vld [vmem:[%s2776_s5 + $0x10] sm:$0xff]  ;;  %v52_v13 = vld [vmem:[%s2776_s5 + $0x8] sm:$0xff]  ;;  %302 = vmatprep.mubr.f32.mxu1 %v2781_v8 }
   0x6   :  { %v1947_v12 = vld [vmem:[%s2772_s1] sm:$0xff]  ;;  %70 = vperm.xlu0 %1833, %v51_v10   ;;  %80 = vperm.xlu1 %1834, %v53_v11   ;;  %v54_v14 = vld [vmem:[%s2776_s5 + $0x18] sm:$0xff]  ;;  %v1962_v15 = vld [vmem:[%s2772_s1 + $0x8] sm:$0xff] }
   0x7   :  { %1742 = vmatprep.subr.msk.bf16.mxu0 %vm1926_vm2, %v1740_v4 }
   0x8   :  { %1745 = vmatpush1.bf16.msk.msra.mxu0 %vm1926_vm2, %v1743_v7 }
   0xa   :  { %75 = vperm.xlu0 %1833, %v52_v13  }
   0xb   :  { %1674 = vmatmul.mubr.msk.f32.vlgmr.msra.gmra.mrb[0].mxu0 %vm88_vm3, %v1947_v12 }
   0xc   :  { %178 = vmatprep.mubr.f32.mxu0 %v2781_v8 }
   0xd   :  { %16 = vsyncpa [#allocation4], 0  ;;  %v55_v16 = vld [vmem:[%s2777_s6] sm:$0xff]  ;;  %85 = vperm.xlu1 %1834, %v54_v14   ;;  %v56_v17 = vld [vmem:[%s2777_s6 + $0x8] sm:$0xff]  ;;  %vm225_vm4 = vcmask 261120  }
   0xe   :  { %v1976_v18 = vld [vmem:[%s2772_s1 + $0x10] sm:$0xff]  ;;  %207 = vperm.xlu0 %1833, %v55_v16   ;;  %v58_v20 = vld [vmem:[%s2777_s6 + $0x18] sm:$0xff]  ;;  %v59_v22 = vld [vmem:[%s2778_s7] sm:$0xff] }
   0xf   :  { %1675 = vmatmul.mubr.msk.f32.gmra.mrb[2].mxu0 %vm88_vm3, %v1962_v15  ;;  %v57_v19 = vld [vmem:[%s2777_s6 + $0x10] sm:$0xff]  ;;  %v1990_v21 = vld [vmem:[%s2772_s1 + $0x18] sm:$0xff]  ;;  %v60_v23 = vld [vmem:[%s2778_s7 + $0x8] sm:$0xff] }
  0x10   :  { %184 = vmatprep.mubr.f32.mxu0 %v2781_v8  ;;  %v61_v24 = vld [vmem:[%s2778_s7 + $0x10] sm:$0xff]  ;;  %v62_v25 = vld [vmem:[%s2778_s7 + $0x18] sm:$0xff]  ;;  %v47_v26 = vld [vmem:[%s2775_s4] sm:$0xff] }
  0x11   :  { %212 = vperm.xlu1 %1834, %v56_v17   ;;  %v48_v27 = vld [vmem:[%s2775_s4 + $0x8] sm:$0xff]  ;;  %v49_v28 = vld [vmem:[%s2775_s4 + $0x10] sm:$0xff]  ;;  %v50_v29 = vld [vmem:[%s2775_s4 + $0x18] sm:$0xff] }
  0x12   :  { %217 = vperm.xlu0 %1833, %v57_v19   ;;  %v63_v30 = vld [vmem:[#allocation2] sm:$0x1]  ;;  %v1687_v58 = vld [vmem:[%s2771_s0 + $0x18] sm:$0xff]  ;;  %v1686_v1 = vld [vmem:[%s2771_s0 + $0x10] sm:$0xff] }
  0x13   :  { %1676 = vmatmul.mubr.msk.f32.gmra.mrb[4].mxu0 %vm88_vm3, %v1976_v18  ;;  %v1689_v59 = vld [vmem:[%s2771_s0 + $0x58] sm:$0x1f]  ;;  %v1688_v2 = vld [vmem:[%s2771_s0 + $0x50] sm:$0x1f]  ;;  %v2090_v4 = vld [vmem:[%s2773_s2] sm:$0xff] }
  0x14   :  { %190 = vmatprep.mubr.f32.mxu0 %v2781_v8  ;;  %v1762_v0 = vpack.c.bf16 %v1689_v59, %v1687_v58  ;;  %v1765_v6 = vpack.c.bf16 %v1688_v2, %v1686_v1  ;;  %v2100_v7 = vld [vmem:[%s2773_s2 + $0x8] sm:$0xff]  ;;  %v2110_v9 = vld [vmem:[%s2773_s2 + $0x10] sm:$0xff]  ;;  %v2118_v10 = vld [vmem:[%s2773_s2 + $0x18] sm:$0xff] }
  0x15   :  { %222 = vperm.xlu1 %1834, %v58_v20  }
  0x16   :  { %345 = vperm.xlu0 %1833, %v59_v22  }
  0x17   :  { %1677 = vmatmul.mubr.msk.f32.gmra.mrb[6].mxu0 %vm88_vm3, %v1990_v21 }
  0x18   :  { %439 = vmatprep.mubr.f32.mxu0 %v2781_v8 }
  0x19   :  { %350 = vperm.xlu1 %1834, %v60_v23  }
  0x1a   :  { %355 = vperm.xlu0 %1833, %v61_v24  }
  0x1d   :  { %360 = vperm.xlu1 %1834, %v62_v25  }
  0x1e   :  { %482 = vperm.xlu0 %1833, %v47_v26  }
  0x21   :  { %487 = vperm.xlu1 %1834, %v48_v27  }
  0x22   :  { %492 = vperm.xlu0 %1833, %v49_v28  }
  0x25   :  { %497 = vperm.xlu1 %1834, %v50_v29  }
  0x26   :  { %528 = vperm.xlu0 %1833, %v63_v30  }
  0x85   :  { %v2019_v31 = vpop.permute.xlu0 %70  ;;  %v2032_v40 = vpop.permute.xlu1 %80 }
  0x89   :  { %v2021_v34 = vpop.permute.xlu0 %75 }
  0x8c   :  { %v2049_v50 = vpop.permute.xlu1 %85 }
  0x8d   :  { %v2135_v13 = vpop.permute.xlu0 %207 }
  0x90   :  { %v2139_v19 = vpop.permute.xlu1 %212 }
  0x91   :  { %v2143_v30 = vpop.permute.xlu0 %217 }
  0xde   :  { %v174_v32 = vpop.f32.mrb[0].mxu0 }
  0xdf   :  { %v176_v33 = vpop.f32.mrb[1].mxu0  ;;  %v2027_v37 = vadd.f32 %v174_v32, %v2019_v31 }
  0xe0   :  { %v2024_v35 = vadd.f32 %v176_v33, %v2019_v31 }
  0xe1   :  { %v197_v46 = vmax.f32 %v2027_v37, 0.0 }
  0xe2   :  { %v180_v36 = vpop.f32.mrb[2].mxu0  ;;  %v198_v43 = vmax.f32 %v2024_v35, 0.0 }
  0xe3   :  { %v2030_v38 = vadd.f32 %v180_v36, %v2021_v34  ;;  %v182_v39 = vpop.f32.mrb[3].mxu0 }
  0xe4   :  { %v2035_v41 = vadd.f32 %v182_v39, %v2021_v34 }
  0xe5   :  { %v199_v42 = vmax.f32 %v2030_v38, 0.0  ;;  %v2163_v38 = vpop.permute.xlu1 %222 }
  0xe6   :  { %v200_v44 = vmax.f32 %v2035_v41, 0.0  ;;  %v186_v45 = vpop.f32.mrb[4].mxu0 }
  0xe7   :  { %v188_v47 = vpop.f32.mrb[5].mxu0  ;;  %v1748_v49 = vpack.c.bf16 %v199_v42, %v197_v46  ;;  %v2055_v53 = vadd.f32 %v186_v45, %v2032_v40 }
  0xe8   :  { %v1746_v48 = vpack.c.bf16 %v200_v44, %v198_v43  ;;  %v2052_v51 = vadd.f32 %v188_v47, %v2032_v40 }
  0xe9   :  { %v201_v62 = vmax.f32 %v2055_v53, 0.0 }
  0xea   :  { %v192_v52 = vpop.f32.mrb[6].mxu0  ;;  %1747 = vmatprep.subr.bf16.mxu1 %v1746_v48  ;;  %v202_v60 = vmax.f32 %v2052_v51, 0.0 }
  0xeb   :  { %v2058_v54 = vadd.f32 %v192_v52, %v2049_v50  ;;  %v194_v55 = vpop.f32.mrb[7].mxu0  ;;  %1749 = vmatpush1.bf16.msra.mxu1 %v1748_v49 }
  0xec   :  { %v2061_v56 = vadd.f32 %v194_v55, %v2049_v50 }
  0xed   :  { %v203_v57 = vmax.f32 %v2058_v54, 0.0 }
  0xee   :  { %v204_v61 = vmax.f32 %v2061_v56, 0.0 }
  0xef   :  { %v1752_v3 = vpack.c.bf16 %v203_v57, %v201_v62 }
  0xf0   :  { %v1750_v63 = vpack.c.bf16 %v204_v61, %v202_v60 }
  0xf2   :  { %1751 = vmatprep.subr.bf16.mxu1 %v1750_v63 }
  0xf3   :  { %1753 = vmatpush1.bf16.msra.mxu1 %v1752_v3 }
  0xf4   :  { %1764 = vmatprep.subr.msk.bf16.mxu1 %vm1926_vm2, %v1762_v0 }
  0xf6   :  { %1678 = vmatmul.mubr.msk.f32.vlgmr.msra.gmra.mrb[0].mxu1 %vm225_vm4, %v2090_v4 }
  0xf7   :  { %308 = vmatprep.mubr.f32.mxu1 %v2781_v8  ;;  %1767 = vmatpush1.bf16.msk.msra.mxu1 %vm1926_vm2, %v1765_v6 }
  0xfa   :  { %1679 = vmatmul.mubr.msk.f32.gmra.mrb[2].mxu1 %vm225_vm4, %v2100_v7 }
  0xfb   :  { %314 = vmatprep.mubr.f32.mxu1 %v2781_v8 }
  0xfe   :  { %1680 = vmatmul.mubr.msk.f32.gmra.mrb[4].mxu1 %vm225_vm4, %v2110_v9 }
  0xff   :  { %320 = vmatprep.mubr.f32.mxu1 %v2781_v8 }
 0x102   :  { %1681 = vmatmul.mubr.msk.f32.gmra.mrb[6].mxu1 %vm225_vm4, %v2118_v10 }
 0x103   :  { %635 = vmatprep.mubr.f32.mxu1 %v2781_v8 }
 0x106   :  { %1692 = vmatmul.mubr.msk.f32.vlgmr.msra.gmra.mrb[8].mxu1 %vm88_vm3, %v1947_v12 }
 0x107   :  { %641 = vmatprep.mubr.f32.mxu1 %v2781_v8 }
 0x10a   :  { %1693 = vmatmul.mubr.msk.f32.gmra.mrb[10].mxu1 %vm88_vm3, %v1962_v15 }
 0x10b   :  { %647 = vmatprep.mubr.f32.mxu1 %v2781_v8 }
 0x10e   :  { %1694 = vmatmul.mubr.msk.f32.gmra.mrb[12].mxu1 %vm88_vm3, %v1976_v18 }
 0x10f   :  { %653 = vmatprep.mubr.f32.mxu1 %v2781_v8 }
 0x112   :  { %1695 = vmatmul.mubr.msk.f32.gmra.mrb[14].mxu1 %vm88_vm3, %v1990_v21 }
 0x113   :  { %837 = vmatprep.mubr.f32.mxu1 %v2781_v8 }
 0x1c9   :  { %v304_v11 = vpop.f32.mrb[0].mxu1 }
 0x1ca   :  { %v306_v14 = vpop.f32.mrb[1].mxu1  ;;  %v305_v17 = vadd.f32 %v304_v11, %v2135_v13 }
 0x1cb   :  { %v307_v16 = vadd.f32 %v306_v14, %v2135_v13 }
 0x1cc   :  { %v327_v26 = vmax.f32 %v305_v17, 0.0 }
 0x1cd   :  { %v310_v20 = vpop.f32.mrb[2].mxu1  ;;  %v328_v24 = vmax.f32 %v307_v16, 0.0 }
 0x1ce   :  { %v311_v22 = vadd.f32 %v310_v20, %v2139_v19  ;;  %v312_v23 = vpop.f32.mrb[3].mxu1  ;;  %v2160_v47 = vadd.f32 %v327_v26, %v197_v46 }
 0x1cf   :  { %v313_v25 = vadd.f32 %v312_v23, %v2139_v19  ;;  %v2151_v36 = vadd.f32 %v328_v24, %v198_v43  ;;  %v2226_v24 = vld [vmem:[%s2774_s3 + $0x8] sm:$0xff] }
 0x1d0   :  { %v329_v27 = vmax.f32 %v311_v22, 0.0 }
 0x1d1   :  { %v330_v28 = vmax.f32 %v313_v25, 0.0  ;;  %v316_v29 = vpop.f32.mrb[4].mxu1 }
 0x1d2   :  { %v2147_v32 = vadd.f32 %v329_v27, %v199_v42  ;;  %v318_v33 = vpop.f32.mrb[5].mxu1  ;;  %v317_v48 = vadd.f32 %v316_v29, %v2143_v30 }
 0x1d3   :  { %v2155_v39 = vadd.f32 %v330_v28, %v200_v44  ;;  %v319_v45 = vadd.f32 %v318_v33, %v2143_v30 }
 0x1d4   :  { %v1756_v43 = vpack.c.bf16 %v2147_v32, %v2160_v47  ;;  %v331_v37 = vmax.f32 %v317_v48, 0.0  ;;  %v2247_v48 = vld [vmem:[%s2774_s3 + $0x10] sm:$0xff] }
 0x1d5   :  { %v322_v42 = vpop.f32.mrb[6].mxu1  ;;  %v1754_v35 = vpack.c.bf16 %v2155_v39, %v2151_v36  ;;  %v332_v49 = vmax.f32 %v319_v45, 0.0 }
 0x1d6   :  { %v323_v41 = vadd.f32 %v322_v42, %v2163_v38  ;;  %v324_v44 = vpop.f32.mrb[7].mxu1  ;;  %v2185_v2 = vadd.f32 %v331_v37, %v201_v62  ;;  %v2207_v62 = vld [vmem:[%s2774_s3] sm:$0xff]  ;;  %v1705_v42 = vld [vmem:[%s2771_s0 + $0x28] sm:$0xff] }
 0x1d7   :  { %v325_v52 = vadd.f32 %v324_v44, %v2163_v38  ;;  %1755 = vmatprep.subr.bf16.mxu0 %v1754_v35  ;;  %v2177_v0 = vadd.f32 %v332_v49, %v202_v60  ;;  %v1707_v35 = vld [vmem:[%s2771_s0 + $0x68] sm:$0x1f] }
 0x1d8   :  { %v333_v46 = vmax.f32 %v323_v41, 0.0  ;;  %1757 = vmatpush1.bf16.msra.mxu0 %v1756_v43 }
 0x1d9   :  { %v334_v55 = vmax.f32 %v325_v52, 0.0  ;;  %v637_v58 = vpop.f32.mrb[8].mxu1  ;;  %v1784_v52 = vpack.c.bf16 %v1707_v35, %v1705_v42 }
 0x1da   :  { %v2173_v59 = vadd.f32 %v333_v46, %v203_v57  ;;  %v639_v63 = vpop.f32.mrb[9].mxu1  ;;  %v2195_v57 = vadd.f32 %v637_v58, %v2019_v31  ;;  %v2272_v46 = vld [vmem:[%s2774_s3 + $0x18] sm:$0xff]  ;;  %v1706_v58 = vld [vmem:[%s2771_s0 + $0x60] sm:$0x1f] }
 0x1db   :  { %v2181_v1 = vadd.f32 %v334_v55, %v204_v61  ;;  %v2188_v3 = vadd.f32 %v639_v63, %v2019_v31  ;;  %v1704_v55 = vld [vmem:[%s2771_s0 + $0x20] sm:$0xff] }
 0x1dc   :  { %v1760_v51 = vpack.c.bf16 %v2173_v59, %v2185_v2  ;;  %v660_v17 = vmax.f32 %v2195_v57, 0.0  ;;  %v1787_v63 = vpack.c.bf16 %v1706_v58, %v1704_v55 }
 0x1dd   :  { %v643_v6 = vpop.f32.mrb[10].mxu1  ;;  %v1758_v54 = vpack.c.bf16 %v2181_v1, %v2177_v0  ;;  %v661_v11 = vmax.f32 %v2188_v3, 0.0 }
 0x1de   :  { %v2198_v56 = vadd.f32 %v643_v6, %v2021_v34  ;;  %v645_v60 = vpop.f32.mrb[11].mxu1  ;;  %v2311_v6 = vpop.permute.xlu0 %345 }
 0x1df   :  { %v2201_v53 = vadd.f32 %v645_v60, %v2021_v34  ;;  %1759 = vmatprep.subr.bf16.mxu0 %v1758_v54  ;;  %v2313_v54 = vpop.permute.xlu1 %350 }
 0x1e0   :  { %v662_v61 = vmax.f32 %v2198_v56, 0.0  ;;  %1761 = vmatpush1.bf16.msra.mxu0 %v1760_v51 }
 0x1e1   :  { %v663_v14 = vmax.f32 %v2201_v53, 0.0  ;;  %v649_v16 = vpop.f32.mrb[12].mxu1 }
 0x1e2   :  { %v651_v20 = vpop.f32.mrb[13].mxu1  ;;  %v1770_v23 = vpack.c.bf16 %v662_v61, %v660_v17  ;;  %v2232_v27 = vadd.f32 %v649_v16, %v2032_v40 }
 0x1e3   :  { %v1768_v22 = vpack.c.bf16 %v663_v14, %v661_v11  ;;  %1682 = vmatmul.mubr.msk.f32.vlgmr.msra.gmra.mrb[8].mxu0 %vm225_vm4, %v2207_v62  ;;  %v2229_v25 = vadd.f32 %v651_v20, %v2032_v40  ;;  %v2316_v20 = vpop.permute.xlu0 %355 }
 0x1e4   :  { %445 = vmatprep.mubr.f32.mxu0 %v2781_v8  ;;  %v2783_v44 = vmax.f32 %v2232_v27, 0.0 }
 0x1e5   :  { %v655_v26 = vpop.f32.mrb[14].mxu1  ;;  %1769 = vmatprep.subr.bf16.mxu0 %v1768_v22  ;;  %v2785_v43 = vmax.f32 %v2229_v25, 0.0 }
 0x1e6   :  { %v2235_v28 = vadd.f32 %v655_v26, %v2049_v50  ;;  %v657_v29 = vpop.f32.mrb[15].mxu1  ;;  %1771 = vmatpush1.bf16.msra.mxu0 %v1770_v23  ;;  %v2319_v26 = vpop.permute.xlu1 %360 }
 0x1e7   :  { %v2238_v33 = vadd.f32 %v657_v29, %v2049_v50  ;;  %1683 = vmatmul.mubr.msk.f32.gmra.mrb[10].mxu0 %vm225_vm4, %v2226_v24  ;;  %v2324_v58 = vpop.permute.xlu0 %482 }
 0x1e8   :  { %v2786_v45 = vmax.f32 %v2235_v28, 0.0  ;;  %451 = vmatprep.mubr.f32.mxu0 %v2781_v8 }
 0x1e9   :  { %v2784_v41 = vmax.f32 %v2238_v33, 0.0 }
 0x1ea   :  { %v1774_v37 = vpack.c.bf16 %v2786_v45, %v2783_v44  ;;  %v2329_v44 = vpop.permute.xlu1 %487 }
 0x1eb   :  { %v1772_v49 = vpack.c.bf16 %v2784_v41, %v2785_v43  ;;  %1684 = vmatmul.mubr.msk.f32.gmra.mrb[12].mxu0 %vm225_vm4, %v2247_v48 }
 0x1ec   :  { %457 = vmatprep.mubr.f32.mxu0 %v2781_v8 }
 0x1ed   :  { %1773 = vmatprep.subr.bf16.mxu0 %v1772_v49 }
 0x1ee   :  { %1775 = vmatpush1.bf16.msra.mxu0 %v1774_v37 }
 0x1ef   :  { %1685 = vmatmul.mubr.msk.f32.gmra.mrb[14].mxu0 %vm225_vm4, %v2272_v46  ;;  %1786 = vmatprep.subr.msk.bf16.mxu0 %vm1926_vm2, %v1784_v52 }
 0x1f0   :  { %732 = vmatprep.mubr.f32.mxu0 %v2781_v8 }
 0x1f3   :  { %1696 = vmatmul.mubr.msk.f32.vlgmr.msra.gmra.mrb[16].mxu0 %vm225_vm4, %v2090_v4 }
 0x1f4   :  { %738 = vmatprep.mubr.f32.mxu0 %v2781_v8  ;;  %1789 = vmatpush1.bf16.msk.msra.mxu0 %vm1926_vm2, %v1787_v63 }
 0x1f7   :  { %1697 = vmatmul.mubr.msk.f32.gmra.mrb[18].mxu0 %vm225_vm4, %v2100_v7 }
 0x1f8   :  { %744 = vmatprep.mubr.f32.mxu0 %v2781_v8 }
 0x1fb   :  { %1698 = vmatmul.mubr.msk.f32.gmra.mrb[20].mxu0 %vm225_vm4, %v2110_v9 }
 0x1fc   :  { %750 = vmatprep.mubr.f32.mxu0 %v2781_v8 }
 0x1ff   :  { %1699 = vmatmul.mubr.msk.f32.gmra.mrb[22].mxu0 %vm225_vm4, %v2118_v10 }
 0x200   :  { %1001 = vmatprep.mubr.f32.mxu0 %v2781_v8 }
 0x203   :  { %1710 = vmatmul.mubr.msk.f32.vlgmr.msra.gmra.mrb[24].mxu0 %vm88_vm3, %v1947_v12 }
 0x204   :  { %1007 = vmatprep.mubr.f32.mxu0 %v2781_v8 }
 0x207   :  { %1711 = vmatmul.mubr.msk.f32.gmra.mrb[26].mxu0 %vm88_vm3, %v1962_v15 }
 0x208   :  { %1013 = vmatprep.mubr.f32.mxu0 %v2781_v8 }
 0x20b   :  { %1712 = vmatmul.mubr.msk.f32.gmra.mrb[28].mxu0 %vm88_vm3, %v1976_v18 }
 0x20c   :  { %1019 = vmatprep.mubr.f32.mxu0 %v2781_v8 }
 0x20f   :  { %1713 = vmatmul.mubr.msk.f32.gmra.mrb[30].mxu0 %vm88_vm3, %v1990_v21 }
 0x210   :  { %1203 = vmatprep.mubr.f32.mxu0 %v2781_v8 }
 0x2b6   :  { %v441_v51 = vpop.f32.mrb[8].mxu0 }
 0x2b7   :  { %v442_v60 = vadd.f32 %v441_v51, %v2311_v6  ;;  %v443_v16 = vpop.f32.mrb[9].mxu0 }
 0x2b8   :  { %v444_v22 = vadd.f32 %v443_v16, %v2311_v6 }
 0x2b9   :  { %v464_v23 = vmax.f32 %v442_v60, 0.0 }
 0x2ba   :  { %v465_v29 = vmax.f32 %v444_v22, 0.0  ;;  %v447_v42 = vpop.f32.mrb[10].mxu0 }
 0x2bb   :  { %v448_v35 = vadd.f32 %v447_v42, %v2313_v54  ;;  %v449_v49 = vpop.f32.mrb[11].mxu0  ;;  %v472_v37 = vadd.f32 %v464_v23, %v2160_v47 }
 0x2bc   :  { %v450_v52 = vadd.f32 %v449_v49, %v2313_v54  ;;  %v473_v63 = vadd.f32 %v465_v29, %v2151_v36 }
 0x2bd   :  { %v466_v55 = vmax.f32 %v448_v35, 0.0  ;;  %v500_v47 = vmul.f32 %v2324_v58, %v472_v37 }
 0x2be   :  { %v467_v51 = vmax.f32 %v450_v52, 0.0  ;;  %v453_v8 = vpop.f32.mrb[12].mxu0  ;;  %v501_v36 = vmul.f32 %v2324_v58, %v473_v63 }
 0x2bf   :  { %v474_v60 = vadd.f32 %v466_v55, %v2147_v32  ;;  %v454_v16 = vadd.f32 %v453_v8, %v2316_v20  ;;  %v455_v22 = vpop.f32.mrb[13].mxu0 }
 0x2c0   :  { %v475_v42 = vadd.f32 %v467_v51, %v2155_v39  ;;  %v456_v49 = vadd.f32 %v455_v22, %v2316_v20  ;;  %v2339_v39 = vpop.permute.xlu0 %492 }
 0x2c1   :  { %v502_v23 = vmul.f32 %v2329_v44, %v474_v60  ;;  %v468_v35 = vmax.f32 %v454_v16, 0.0 }
 0x2c2   :  { %v503_v29 = vmul.f32 %v2329_v44, %v475_v42  ;;  %v469_v52 = vmax.f32 %v456_v49, 0.0  ;;  %v459_v32 = vpop.f32.mrb[14].mxu0 }
 0x2c3   :  { %v508_v55 = vadd.f32 %v502_v23, %v500_v47  ;;  %v476_v8 = vadd.f32 %v468_v35, %v2185_v2  ;;  %v460_v41 = vadd.f32 %v459_v32, %v2319_v26  ;;  %v461_v43 = vpop.f32.mrb[15].mxu0  ;;  %v2346_v35 = vpop.permute.xlu1 %497 }
 0x2c4   :  { %v517_v51 = vadd.f32 %v503_v29, %v501_v36  ;;  %v477_v37 = vadd.f32 %v469_v52, %v2177_v0  ;;  %v462_v60 = vadd.f32 %v461_v43, %v2319_v26  ;;  %v529_v57 = vpop.permute.xlu0 %528 }
 0x2c5   :  { %v504_v16 = vmul.f32 %v2339_v39, %v476_v8  ;;  %v470_v63 = vmax.f32 %v460_v41, 0.0  ;;  %v2787_v8 = vlaneseq }
 0x2c6   :  { %v505_v22 = vmul.f32 %v2339_v39, %v477_v37  ;;  %v471_v42 = vmax.f32 %v462_v60, 0.0  ;;  %v734_v49 = vpop.f32.mrb[16].mxu0 }
 0x2c7   :  { %v509_v47 = vadd.f32 %v508_v55, %v504_v16  ;;  %v478_v2 = vadd.f32 %v470_v63, %v2173_v59  ;;  %v736_v23 = vpop.f32.mrb[17].mxu0  ;;  %v735_v29 = vadd.f32 %v734_v49, %v2135_v13  ;;  %v532_v49 = vshrl.u32 %v2787_v8, 7 }
 0x2c8   :  { %v518_v32 = vadd.f32 %v517_v51, %v505_v22  ;;  %v479_v36 = vadd.f32 %v471_v42, %v2181_v1  ;;  %v737_v0 = vadd.f32 %v736_v23, %v2135_v13 }
 0x2c9   :  { %v506_v43 = vmul.f32 %v2346_v35, %v478_v2  ;;  %v757_v1 = vmax.f32 %v735_v29, 0.0 }
 0x2ca   :  { %v507_v41 = vmul.f32 %v2346_v35, %v479_v36  ;;  %v740_v52 = vpop.f32.mrb[18].mxu0  ;;  %v758_v16 = vmax.f32 %v737_v0, 0.0 }
 0x2cb   :  { %v510_v37 = vadd.f32 %v509_v47, %v506_v43  ;;  %v741_v55 = vadd.f32 %v740_v52, %v2139_v19  ;;  %v742_v59 = vpop.f32.mrb[19].mxu0  ;;  %v2371_v52 = vadd.f32 %v757_v1, %v660_v17 }
 0x2cc   :  { %v519_v60 = vadd.f32 %v518_v32, %v507_v41  ;;  %v743_v51 = vadd.f32 %v742_v59, %v2139_v19  ;;  %v2362_v32 = vadd.f32 %v758_v16, %v661_v11  ;;  %v533_v11 = vsub.s32 0, %v532_v49 }
 0x2cd   :  { %v511_v63 = vrot.slane %v510_v37, 4  ;;  %v759_v22 = vmax.f32 %v741_v55, 0.0 }
 0x2ce   :  { %v520_v42 = vrot.slane %v519_v60, 4  ;;  %v760_v23 = vmax.f32 %v743_v51, 0.0  ;;  %v746_v2 = vpop.f32.mrb[20].mxu0 }
 0x2cf   :  { %v512_v45 = vadd.f32 %v511_v63, %v510_v37  ;;  %v2358_v36 = vadd.f32 %v759_v22, %v662_v61  ;;  %v748_v47 = vpop.f32.mrb[21].mxu0  ;;  %v747_v56 = vadd.f32 %v746_v2, %v2143_v30  ;;  %v1862_v61 = vmov 1966171168  }
 0x2d0   :  { %v521_v43 = vadd.f32 %v520_v42, %v519_v60  ;;  %v2366_v0 = vadd.f32 %v760_v23, %v663_v14  ;;  %v749_v29 = vadd.f32 %v748_v47, %v2143_v30  ;;  %v541_v37 = vunpack.c.l.s4 %v1862_v61 }
 0x2d1   :  { %v513_v41 = vrot.slane %v512_v45, 2  ;;  %v1778_v14 = vpack.c.bf16 %v2358_v36, %v2371_v52  ;;  %v761_v22 = vmax.f32 %v747_v56, 0.0  ;;  %v2797_v56 = vmax.f32 %v2238_v33, 0.0 }
 0x2d2   :  { %v522_v55 = vrot.slane %v521_v43, 2  ;;  %v752_v59 = vpop.f32.mrb[22].mxu0  ;;  %v1776_v3 = vpack.c.bf16 %v2366_v0, %v2362_v32  ;;  %v762_v51 = vmax.f32 %v749_v29, 0.0  ;;  %v542_v23 = vunpack.c.0.s8 %v541_v37 }
 0x2d3   :  { %v514_v53 = vadd.f32 %v513_v41, %v512_v45  ;;  %v753_v60 = vadd.f32 %v752_v59, %v2163_v38  ;;  %v754_v16 = vpop.f32.mrb[23].mxu0  ;;  %v2380_v41 = vrot.slane %v529_v57, %v533_v11  ;;  %v2795_v59 = vmax.f32 %v2235_v28, 0.0 }
 0x2d4   :  { %v523_v17 = vadd.f32 %v522_v55, %v521_v43  ;;  %v755_v63 = vadd.f32 %v754_v16, %v2163_v38  ;;  %1777 = vmatprep.subr.bf16.mxu1 %v1776_v3  ;;  %v2796_v55 = vmax.f32 %v2229_v25, 0.0  ;;  %v2798_v11 = vmax.f32 %v2232_v27, 0.0 }
 0x2d5   :  { %v515_v1 = vrot.slane %v514_v53, 1  ;;  %v763_v42 = vmax.f32 %v753_v60, 0.0  ;;  %1779 = vmatpush1.bf16.msra.mxu1 %v1778_v14 }
 0x2d6   :  { %v524_v2 = vrot.slane %v523_v17, 1  ;;  %v764_v47 = vmax.f32 %v755_v63, 0.0  ;;  %v1003_v45 = vpop.f32.mrb[24].mxu0  ;;  %v2388_v3 = vadd.f32 %v762_v51, %v2796_v55  ;;  %v2397_v60 = vadd.f32 %v761_v22, %v2798_v11 }
 0x2d7   :  { %v516_v61 = vadd.f32 %v515_v1, %v514_v53  ;;  %v2384_v8 = vadd.f32 %v763_v42, %v2795_v59  ;;  %v1005_v43 = vpop.f32.mrb[25].mxu0  ;;  %v2399_v53 = vsub.s32 %v542_v23, %v532_v49 }
 0x2d8   :  { %v525_v29 = vadd.f32 %v524_v2, %v523_v17  ;;  %v2392_v14 = vadd.f32 %v764_v47, %v2797_v56  ;;  %v2403_v16 = vadd.f32 %v1005_v43, %v2019_v31  ;;  %v2410_v17 = vadd.f32 %v1003_v45, %v2019_v31 }
 0x2d9   :  { %v535_v37 = vadd.f32 %v2380_v41, %v516_v61  ;;  %v1782_v33 = vpack.c.bf16 %v2384_v8, %v2397_v60  ;;  %v2799_v47 = vlaneseq  ;;  %v2802_v56 = vmov 0.0  }
 0x2da   :  { %v536_v28 = vadd.f32 %v2380_v41, %v525_v29  ;;  %v1009_v25 = vpop.f32.mrb[26].mxu0  ;;  %v1780_v57 = vpack.c.bf16 %v2392_v14, %v2388_v3  ;;  %v1027_v22 = vmax.f32 %v2403_v16, 0.0  ;;  %v2792_v61 = vmax.f32 %v2410_v17, 0.0 }
 0x2db   :  { %v2413_v27 = vadd.f32 %v1009_v25, %v2021_v34  ;;  %v1011_v49 = vpop.f32.mrb[27].mxu0  ;;  %vm2423_vm5 = vcmp.lt.s32.totalorder %v2799_v47, 256 }
 0x2dc   :  { %v2416_v51 = vadd.f32 %v1011_v49, %v2021_v34  ;;  %1781 = vmatprep.subr.bf16.mxu1 %v1780_v57  ;;  %v539_v63 = vcombine.low %v535_v37, %v536_v28 }
 0x2dd   :  { %v1028_v1 = vmax.f32 %v2413_v27, 0.0  ;;  %1783 = vmatpush1.bf16.msra.mxu1 %v1782_v33 }
 0x2de   :  { %v1029_v42 = vmax.f32 %v2416_v51, 0.0  ;;  %v1015_v23 = vpop.f32.mrb[28].mxu0  ;;  %v546_v2 = vrot.slane %v539_v63, %v2399_v53  ;;  %v1723_v63 = vld [vmem:[%s2771_s0 + $0x38] sm:$0xff] }
 0x2df   :  { %v1017_v59 = vpop.f32.mrb[29].mxu0  ;;  %v1792_v55 = vpack.c.bf16 %v1028_v1, %v2792_v61  ;;  %v2446_v28 = vadd.f32 %v1015_v23, %v2032_v40  ;;  %v1725_v23 = vld [vmem:[%s2771_s0 + $0x78] sm:$0x1f] }
 0x2e0   :  { %v1790_v43 = vpack.c.bf16 %v1029_v42, %v1027_v22  ;;  %1700 = vmatmul.mubr.msk.f32.vlgmr.msra.gmra.mrb[16].mxu1 %vm225_vm4, %v2207_v62  ;;  %v553_v29 = vrot.slane %v546_v2, %v2399_v53  ;;  %v2441_v37 = vadd.f32 %v1017_v59, %v2032_v40 }
 0x2e1   :  { %843 = vmatprep.mubr.f32.mxu1 %v2802_v56  ;;  %v2788_v59 = vmax.f32 %v2446_v28, 0.0 }
 0x2e2   :  { %v1021_v11 = vpop.f32.mrb[30].mxu0  ;;  %1791 = vmatprep.subr.bf16.mxu1 %v1790_v43  ;;  %559 = vst.msk [vmem:[#allocation3] sm:$0x3] %vm2423_vm5, %v553_v29  ;;  %v2790_v2 = vmax.f32 %v2441_v37, 0.0  ;;  %v1806_v29 = vpack.c.bf16 %v1725_v23, %v1723_v63 }
 0x2e3   :  { %v2449_v25 = vadd.f32 %v1021_v11, %v2049_v50  ;;  %v1023_v57 = vpop.f32.mrb[31].mxu0  ;;  %1793 = vmatpush1.bf16.msra.mxu1 %v1792_v55  ;;  %v1722_v11 = vld [vmem:[%s2771_s0 + $0x30] sm:$0xff] }
 0x2e4   :  { %v2452_v33 = vadd.f32 %v1023_v57, %v2049_v50  ;;  %1701 = vmatmul.mubr.msk.f32.gmra.mrb[18].mxu1 %vm225_vm4, %v2226_v24  ;;  %v1724_v57 = vld [vmem:[%s2771_s0 + $0x70] sm:$0x1f]  ;;  %s1863_s0 = smov [#allocation3]  }
 0x2e5   :  { %v2791_v49 = vmax.f32 %v2449_v25, 0.0  ;;  %849 = vmatprep.mubr.f32.mxu1 %v2802_v56  ;;  %v1809_v63 = vpack.c.bf16 %v1724_v57, %v1722_v11  ;;  %s1664_s19 = sshll.u32 %s1863_s0, 4  ;;  %s1665_s19 = int_to_ptr.vmem [resolvable:$true] %s1664_s19 }
 0x2e6   :  { %v2789_v47 = vmax.f32 %v2452_v33, 0.0  ;;  %s1835_s20 = scalar_lea.vmem %s1665_s19, 128  ;;  %p1840_p1 = scmp.lt.s32.totalorder %s1665_s19, %s1665_s19 }
 0x2e7   :  { %v1796_v55 = vpack.c.bf16 %v2791_v49, %v2788_v59  ;;  %p1836_p0 = scmp.ne.s32.totalorder %s1665_s19, %s1835_s20  ;;  %p1841_p2 = scmp.lt.s32.totalorder %s1835_s20, %s1835_s20 }
 0x2e8   :  { %v1794_v43 = vpack.c.bf16 %v2789_v47, %v2790_v2  ;;  %1702 = vmatmul.mubr.msk.f32.gmra.mrb[20].mxu1 %vm225_vm4, %v2247_v48 }
 0x2e9   :  { %855 = vmatprep.mubr.f32.mxu1 %v2802_v56  ;;  %p1842_p3 = por %p1841_p2, %p1840_p1 }
 0x2ea   :  { %1795 = vmatprep.subr.bf16.mxu1 %v1794_v43 }
 0x2eb   :  { %1797 = vmatpush1.bf16.msra.mxu1 %v1796_v55  ;;  %p1843_p4 = pnand %p1842_p3, %p1836_p0 }
 0x2ec   :  { %1703 = vmatmul.mubr.msk.f32.gmra.mrb[22].mxu1 %vm225_vm4, %v2272_v46  ;;  %1808 = vmatprep.subr.msk.bf16.mxu1 %vm1926_vm2, %v1806_v29 }
 0x2ed   :  { %1098 = vmatprep.mubr.f32.mxu1 %v2802_v56 }
 0x2f0   :  { %1714 = vmatmul.mubr.msk.f32.vlgmr.msra.gmra.mrb[24].mxu1 %vm225_vm4, %v2090_v4 }
 0x2f1   :  { %1104 = vmatprep.mubr.f32.mxu1 %v2802_v56  ;;  %1811 = vmatpush1.bf16.msk.msra.mxu1 %vm1926_vm2, %v1809_v63 }
 0x2f4   :  { %1715 = vmatmul.mubr.msk.f32.gmra.mrb[26].mxu1 %vm225_vm4, %v2100_v7 }
 0x2f5   :  { %1110 = vmatprep.mubr.f32.mxu1 %v2802_v56 }
 0x2f8   :  { %1716 = vmatmul.mubr.msk.f32.gmra.mrb[28].mxu1 %vm225_vm4, %v2110_v9 }
 0x2f9   :  { %1116 = vmatprep.mubr.f32.mxu1 %v2802_v56 }
 0x2fc   :  { %1717 = vmatmul.mubr.msk.f32.gmra.mrb[30].mxu1 %vm225_vm4, %v2118_v10 }
 0x2fd   :  { %1367 = vmatprep.mubr.f32.mxu1 %v2802_v56 }
 0x300   :  { %1728 = vmatmul.mubr.msk.f32.vlgmr.msra.gmra.mrb[32].mxu1 %vm88_vm3, %v1947_v12 }
 0x301   :  { %1373 = vmatprep.mubr.f32.mxu1 %v2802_v56 }
 0x304   :  { %1729 = vmatmul.mubr.msk.f32.gmra.mrb[34].mxu1 %vm88_vm3, %v1962_v15 }
 0x305   :  { %1379 = vmatprep.mubr.f32.mxu1 %v2802_v56 }
 0x308   :  { %1730 = vmatmul.mubr.msk.f32.gmra.mrb[36].mxu1 %vm88_vm3, %v1976_v18 }
 0x309   :  { %1385 = vmatprep.mubr.f32.mxu1 %v2802_v56 }
 0x30c   :  { %1731 = vmatmul.mubr.msk.f32.gmra.mrb[38].mxu1 %vm88_vm3, %v1990_v21 }
 0x30d   :  { %1569 = vmatprep.mubr.f32.mxu1 %v2802_v56 }
 0x3b3   :  { %v839_v5 = vpop.f32.mrb[16].mxu1 }
 0x3b4   :  { %v840_v12 = vadd.f32 %v839_v5, %v2311_v6  ;;  %v841_v23 = vpop.f32.mrb[17].mxu1 }
 0x3b5   :  { %v842_v43 = vadd.f32 %v841_v23, %v2311_v6 }
 0x3b6   :  { %v862_v29 = vmax.f32 %v840_v12, 0.0 }
 0x3b7   :  { %v863_v15 = vmax.f32 %v842_v43, 0.0  ;;  %v845_v55 = vpop.f32.mrb[18].mxu1 }
 0x3b8   :  { %v846_v11 = vadd.f32 %v845_v55, %v2313_v54  ;;  %v847_v57 = vpop.f32.mrb[19].mxu1  ;;  %v870_v63 = vadd.f32 %v862_v29, %v2371_v52 }
 0x3b9   :  { %v848_v18 = vadd.f32 %v847_v57, %v2313_v54  ;;  %v871_v21 = vadd.f32 %v863_v15, %v2362_v32 }
 0x3ba   :  { %v864_v59 = vmax.f32 %v846_v11, 0.0  ;;  %v878_v55 = vmul.f32 %v870_v63, %v2324_v58 }
 0x3bb   :  { %v865_v47 = vmax.f32 %v848_v18, 0.0  ;;  %v851_v2 = vpop.f32.mrb[20].mxu1  ;;  %v879_v52 = vmul.f32 %v871_v21, %v2324_v58 }
 0x3bc   :  { %v872_v5 = vadd.f32 %v864_v59, %v2358_v36  ;;  %v852_v49 = vadd.f32 %v851_v2, %v2316_v20  ;;  %v853_v23 = vpop.f32.mrb[21].mxu1 }
 0x3bd   :  { %v873_v12 = vadd.f32 %v865_v47, %v2366_v0  ;;  %v854_v43 = vadd.f32 %v853_v23, %v2316_v20 }
 0x3be   :  { %v880_v57 = vmul.f32 %v872_v5, %v2329_v44  ;;  %v866_v61 = vmax.f32 %v852_v49, 0.0 }
 0x3bf   :  { %v881_v32 = vmul.f32 %v873_v12, %v2329_v44  ;;  %v867_v29 = vmax.f32 %v854_v43, 0.0  ;;  %v857_v15 = vpop.f32.mrb[22].mxu1 }
 0x3c0   :  { %v886_v11 = vadd.f32 %v880_v57, %v878_v55  ;;  %v874_v36 = vadd.f32 %v866_v61, %v2397_v60  ;;  %v858_v2 = vadd.f32 %v857_v15, %v2319_v26  ;;  %v859_v59 = vpop.f32.mrb[23].mxu1 }
 0x3c1   :  { %v895_v0 = vadd.f32 %v881_v32, %v879_v52  ;;  %v875_v47 = vadd.f32 %v867_v29, %v2388_v3  ;;  %v860_v18 = vadd.f32 %v859_v59, %v2319_v26 }
 0x3c2   :  { %v882_v63 = vmul.f32 %v874_v36, %v2339_v39  ;;  %v868_v49 = vmax.f32 %v858_v2, 0.0 }
 0x3c3   :  { %v883_v21 = vmul.f32 %v875_v47, %v2339_v39  ;;  %v869_v5 = vmax.f32 %v860_v18, 0.0  ;;  %v1100_v23 = vpop.f32.mrb[24].mxu1 }
 0x3c4   :  { %v887_v12 = vadd.f32 %v886_v11, %v882_v63  ;;  %v876_v43 = vadd.f32 %v868_v49, %v2384_v8  ;;  %v1102_v55 = vpop.f32.mrb[25].mxu1  ;;  %v1101_v52 = vadd.f32 %v1100_v23, %v2135_v13 }
 0x3c5   :  { %v896_v60 = vadd.f32 %v895_v0, %v883_v21  ;;  %v877_v61 = vadd.f32 %v869_v5, %v2392_v14  ;;  %v1103_v57 = vadd.f32 %v1102_v55, %v2135_v13 }
 0x3c6   :  { %v884_v3 = vmul.f32 %v876_v43, %v2346_v35  ;;  %v1123_v47 = vmax.f32 %v1101_v52, 0.0 }
 0x3c7   :  { %v885_v32 = vmul.f32 %v877_v61, %v2346_v35  ;;  %v1106_v29 = vpop.f32.mrb[26].mxu1  ;;  %v1124_v59 = vmax.f32 %v1103_v57, 0.0  ;;  %v2803_v57 = vmax.f32 %v2410_v17, 0.0 }
 0x3c8   :  { %v888_v15 = vadd.f32 %v887_v12, %v884_v3  ;;  %v1107_v36 = vadd.f32 %v1106_v29, %v2139_v19  ;;  %v1108_v2 = vpop.f32.mrb[27].mxu1 }
 0x3c9   :  { %v897_v11 = vadd.f32 %v896_v60, %v885_v32  ;;  %v1109_v8 = vadd.f32 %v1108_v2, %v2139_v19  ;;  %v2549_v43 = vadd.f32 %v1124_v59, %v1027_v22  ;;  %v2558_v3 = vadd.f32 %v1123_v47, %v2803_v57 }
 0x3ca   :  { %v889_v0 = vrot.slane %v888_v15, 4  ;;  %v1125_v14 = vmax.f32 %v1107_v36, 0.0  ;;  %v2807_v57 = vmax.f32 %v2446_v28, 0.0 }
 0x3cb   :  { %v898_v18 = vrot.slane %v897_v11, 4  ;;  %v1126_v63 = vmax.f32 %v1109_v8, 0.0  ;;  %v1112_v49 = vpop.f32.mrb[28].mxu1 }
 0x3cc   :  { %v890_v21 = vadd.f32 %v889_v0, %v888_v15  ;;  %v2545_v5 = vadd.f32 %v1125_v14, %v1028_v1  ;;  %v1114_v23 = vpop.f32.mrb[29].mxu1  ;;  %v1113_v27 = vadd.f32 %v1112_v49, %v2143_v30  ;;  %v2804_v14 = vmax.f32 %v2449_v25, 0.0 }
 0x3cd   :  { %v899_v12 = vadd.f32 %v898_v18, %v897_v11  ;;  %v2553_v55 = vadd.f32 %v1126_v63, %v1029_v42  ;;  %v1115_v60 = vadd.f32 %v1114_v23, %v2143_v30 }
 0x3ce   :  { %v891_v61 = vrot.slane %v890_v21, 2  ;;  %v1800_v51 = vpack.c.bf16 %v2545_v5, %v2558_v3  ;;  %v1127_v2 = vmax.f32 %v1113_v27, 0.0 }
 0x3cf   :  { %v900_v1 = vrot.slane %v899_v12, 2  ;;  %v1118_v52 = vpop.f32.mrb[30].mxu1  ;;  %v1798_v16 = vpack.c.bf16 %v2553_v55, %v2549_v43  ;;  %v1128_v15 = vmax.f32 %v1115_v60, 0.0 }
 0x3d0   :  { %v892_v22 = vadd.f32 %v891_v61, %v890_v21  ;;  %v1119_v42 = vadd.f32 %v1118_v52, %v2163_v38  ;;  %v1120_v32 = vpop.f32.mrb[31].mxu1  ;;  %v2805_v21 = vmax.f32 %v2441_v37, 0.0  ;;  %v2582_v27 = vadd.f32 %v1127_v2, %v2807_v57 }
 0x3d1   :  { %v901_v29 = vadd.f32 %v900_v1, %v899_v12  ;;  %v1121_v17 = vadd.f32 %v1120_v32, %v2163_v38  ;;  %1799 = vmatprep.subr.bf16.mxu0 %v1798_v16  ;;  %v2806_v12 = vmax.f32 %v2452_v33, 0.0 }
 0x3d2   :  { %v893_v36 = vrot.slane %v892_v22, 1  ;;  %v1129_v11 = vmax.f32 %v1119_v42, 0.0  ;;  %1801 = vmatpush1.bf16.msra.mxu0 %v1800_v51  ;;  %v2573_v23 = vadd.f32 %v1128_v15, %v2805_v21 }
 0x3d3   :  { %v902_v59 = vrot.slane %v901_v29, 1  ;;  %v1130_v8 = vmax.f32 %v1121_v17, 0.0  ;;  %v1369_v0 = vpop.f32.mrb[32].mxu1 }
 0x3d4   :  { %v894_v47 = vadd.f32 %v893_v36, %v892_v22  ;;  %v2569_v18 = vadd.f32 %v1129_v11, %v2804_v14  ;;  %v1371_v63 = vpop.f32.mrb[33].mxu1  ;;  %v2593_v16 = vadd.f32 %v1369_v0, %v2019_v31 }
 0x3d5   :  { %v903_v49 = vadd.f32 %v902_v59, %v901_v29  ;;  %v2577_v60 = vadd.f32 %v1130_v8, %v2806_v12  ;;  %v2586_v1 = vadd.f32 %v1371_v63, %v2019_v31 }
 0x3d6   :  { %v904_v61 = vadd.f32 %v894_v47, %v2380_v41  ;;  %v1804_v33 = vpack.c.bf16 %v2569_v18, %v2582_v27  ;;  %v1392_v36 = vmax.f32 %v2593_v16, 0.0 }
 0x3d7   :  { %v905_v25 = vadd.f32 %v903_v49, %v2380_v41  ;;  %v1375_v52 = vpop.f32.mrb[34].mxu1  ;;  %v1802_v37 = vpack.c.bf16 %v2577_v60, %v2573_v23  ;;  %v1393_v29 = vmax.f32 %v2586_v1, 0.0 }
 0x3d8   :  { %v2596_v22 = vadd.f32 %v1375_v52, %v2021_v34  ;;  %v1377_v28 = vpop.f32.mrb[35].mxu1 }
 0x3d9   :  { %v2599_v51 = vadd.f32 %v1377_v28, %v2021_v34  ;;  %1803 = vmatprep.subr.bf16.mxu0 %v1802_v37  ;;  %v908_v42 = vcombine.low %v904_v61, %v905_v25 }
 0x3da   :  { %v1394_v32 = vmax.f32 %v2596_v22, 0.0  ;;  %1805 = vmatpush1.bf16.msra.mxu0 %v1804_v33 }
 0x3db   :  { %v1395_v15 = vmax.f32 %v2599_v51, 0.0  ;;  %v1381_v17 = vpop.f32.mrb[36].mxu1  ;;  %v915_v31 = vrot.slane %v908_v42, %v2399_v53 }
 0x3dc   :  { %v1383_v2 = vpop.f32.mrb[37].mxu1  ;;  %v1814_v59 = vpack.c.bf16 %v1394_v32, %v1392_v36  ;;  %v2624_v47 = vadd.f32 %v1381_v17, %v2032_v40 }
 0x3dd   :  { %v1812_v34 = vpack.c.bf16 %v1395_v15, %v1393_v29  ;;  %1718 = vmatmul.mubr.msk.f32.vlgmr.msra.gmra.mrb[32].mxu0 %vm225_vm4, %v2207_v62  ;;  %v922_v11 = vrot.slane %v915_v31, %v2399_v53  ;;  %v2619_v8 = vadd.f32 %v1383_v2, %v2032_v40 }
 0x3de   :  { %1209 = vmatprep.mubr.f32.mxu0 %v2802_v56  ;;  %v1396_v61 = vmax.f32 %v2624_v47, 0.0 }
 0x3df   :  { %v1387_v0 = vpop.f32.mrb[38].mxu1  ;;  %1813 = vmatprep.subr.bf16.mxu0 %v1812_v34  ;;  %925 = vst.msk [vmem:[#allocation3 + $0x2] sm:$0x3] %vm2423_vm5, %v922_v11  ;;  %v1397_v12 = vmax.f32 %v2619_v8, 0.0 }
 0x3e0   :  { %v2627_v14 = vadd.f32 %v1387_v0, %v2049_v50  ;;  %v1389_v63 = vpop.f32.mrb[39].mxu1  ;;  %1815 = vmatpush1.bf16.msra.mxu0 %v1814_v59 }
 0x3e1   :  { %v2630_v49 = vadd.f32 %v1389_v63, %v2049_v50  ;;  %1719 = vmatmul.mubr.msk.f32.gmra.mrb[34].mxu0 %vm225_vm4, %v2226_v24 }
 0x3e2   :  { %v1398_v21 = vmax.f32 %v2627_v14, 0.0  ;;  %1215 = vmatprep.mubr.f32.mxu0 %v2802_v56 }
 0x3e3   :  { %v1399_v40 = vmax.f32 %v2630_v49, 0.0 }
 0x3e4   :  { %v1818_v50 = vpack.c.bf16 %v1398_v21, %v1396_v61 }
 0x3e5   :  { %v1816_v57 = vpack.c.bf16 %v1399_v40, %v1397_v12  ;;  %1720 = vmatmul.mubr.msk.f32.gmra.mrb[36].mxu0 %vm225_vm4, %v2247_v48 }
 0x3e6   :  { %1221 = vmatprep.mubr.f32.mxu0 %v2802_v56 }
 0x3e7   :  { %1817 = vmatprep.subr.bf16.mxu0 %v1816_v57 }
 0x3e8   :  { %1819 = vmatpush1.bf16.msra.mxu0 %v1818_v50 }
 0x3e9   :  { %1721 = vmatmul.mubr.msk.f32.gmra.mrb[38].mxu0 %vm225_vm4, %v2272_v46 }
 0x3ea   :  { %1464 = vmatprep.mubr.f32.mxu0 %v2802_v56 }
 0x3ed   :  { %1732 = vmatmul.mubr.msk.f32.vlgmr.msra.gmra.mrb[40].mxu0 %vm225_vm4, %v2090_v4 }
 0x3ee   :  { %1470 = vmatprep.mubr.f32.mxu0 %v2802_v56 }
 0x3f1   :  { %1733 = vmatmul.mubr.msk.f32.gmra.mrb[42].mxu0 %vm225_vm4, %v2100_v7 }
 0x3f2   :  { %1476 = vmatprep.mubr.f32.mxu0 %v2802_v56 }
 0x3f5   :  { %1734 = vmatmul.mubr.msk.f32.gmra.mrb[44].mxu0 %vm225_vm4, %v2110_v9 }
 0x3f6   :  { %1482 = vmatprep.mubr.f32.mxu0 %v2802_v56 }
 0x3f9   :  { %1735 = vmatmul.mubr.msk.f32.gmra.mrb[46].mxu0 %vm225_vm4, %v2118_v10 }
 0x4b0   :  { %v1205_v25 = vpop.f32.mrb[32].mxu0 }
 0x4b1   :  { %v1206_v52 = vadd.f32 %v1205_v25, %v2311_v6  ;;  %v1207_v37 = vpop.f32.mrb[33].mxu0 }
 0x4b2   :  { %v1208_v4 = vadd.f32 %v1207_v37, %v2311_v6 }
 0x4b3   :  { %v1228_v33 = vmax.f32 %v1206_v52, 0.0 }
 0x4b4   :  { %v1229_v28 = vmax.f32 %v1208_v4, 0.0  ;;  %v1211_v42 = vpop.f32.mrb[34].mxu0 }
 0x4b5   :  { %v1212_v7 = vadd.f32 %v1211_v42, %v2313_v54  ;;  %v1213_v17 = vpop.f32.mrb[35].mxu0  ;;  %v1236_v9 = vadd.f32 %v1228_v33, %v2558_v3 }
 0x4b6   :  { %v1214_v31 = vadd.f32 %v1213_v17, %v2313_v54  ;;  %v1237_v34 = vadd.f32 %v1229_v28, %v2549_v43 }
 0x4b7   :  { %v1230_v2 = vmax.f32 %v1212_v7, 0.0  ;;  %v1244_v25 = vmul.f32 %v1236_v9, %v2324_v58 }
 0x4b8   :  { %v1231_v10 = vmax.f32 %v1214_v31, 0.0  ;;  %v1217_v11 = vpop.f32.mrb[36].mxu0  ;;  %v1245_v3 = vmul.f32 %v1237_v34, %v2324_v58 }
 0x4b9   :  { %v1238_v59 = vadd.f32 %v1230_v2, %v2545_v5  ;;  %v1218_v0 = vadd.f32 %v1217_v11, %v2316_v20  ;;  %v1219_v63 = vpop.f32.mrb[37].mxu0 }
 0x4ba   :  { %v1239_v57 = vadd.f32 %v1231_v10, %v2553_v55  ;;  %v1220_v50 = vadd.f32 %v1219_v63, %v2316_v20 }
 0x4bb   :  { %v1246_v52 = vmul.f32 %v1238_v59, %v2329_v44  ;;  %v1232_v37 = vmax.f32 %v1218_v0, 0.0 }
 0x4bc   :  { %v1247_v43 = vmul.f32 %v1239_v57, %v2329_v44  ;;  %v1233_v4 = vmax.f32 %v1220_v50, 0.0  ;;  %v1223_v33 = vpop.f32.mrb[38].mxu0 }
 0x4bd   :  { %v1252_v28 = vadd.f32 %v1246_v52, %v1244_v25  ;;  %v1240_v5 = vadd.f32 %v1232_v37, %v2582_v27  ;;  %v1224_v42 = vadd.f32 %v1223_v33, %v2319_v26  ;;  %v1225_v7 = vpop.f32.mrb[39].mxu0 }
 0x4be   :  { %v1261_v55 = vadd.f32 %v1247_v43, %v1245_v3  ;;  %v1241_v17 = vadd.f32 %v1233_v4, %v2573_v23  ;;  %v1226_v31 = vadd.f32 %v1225_v7, %v2319_v26 }
 0x4bf   :  { %v1248_v9 = vmul.f32 %v1240_v5, %v2339_v39  ;;  %v1234_v2 = vmax.f32 %v1224_v42, 0.0 }
 0x4c0   :  { %v1249_v34 = vmul.f32 %v1241_v17, %v2339_v39  ;;  %v1235_v10 = vmax.f32 %v1226_v31, 0.0  ;;  %v1466_v11 = vpop.f32.mrb[40].mxu0 }
 0x4c1   :  { %v1253_v59 = vadd.f32 %v1252_v28, %v1248_v9  ;;  %v1242_v0 = vadd.f32 %v1234_v2, %v2569_v18  ;;  %v1468_v63 = vpop.f32.mrb[41].mxu0  ;;  %v1467_v25 = vadd.f32 %v1466_v11, %v2135_v13 }
 0x4c2   :  { %v1262_v27 = vadd.f32 %v1261_v55, %v1249_v34  ;;  %v1243_v57 = vadd.f32 %v1235_v10, %v2577_v60  ;;  %v1469_v50 = vadd.f32 %v1468_v63, %v2135_v13 }
 0x4c3   :  { %v1250_v23 = vmul.f32 %v1242_v0, %v2346_v35  ;;  %v1489_v42 = vmax.f32 %v1467_v25, 0.0 }
 0x4c4   :  { %v1251_v52 = vmul.f32 %v1243_v57, %v2346_v35  ;;  %v1472_v37 = vpop.f32.mrb[42].mxu0  ;;  %v1490_v28 = vmax.f32 %v1469_v50, 0.0 }
 0x4c5   :  { %v1254_v3 = vadd.f32 %v1253_v59, %v1250_v23  ;;  %v1473_v43 = vadd.f32 %v1472_v37, %v2139_v19  ;;  %v1474_v4 = vpop.f32.mrb[43].mxu0  ;;  %v1497_v59 = vadd.f32 %v1489_v42, %v1392_v36 }
 0x4c6   :  { %v1263_v33 = vadd.f32 %v1262_v27, %v1251_v52  ;;  %v1475_v18 = vadd.f32 %v1474_v4, %v2139_v19  ;;  %v1498_v34 = vadd.f32 %v1490_v28, %v1393_v29 }
 0x4c7   :  { %v1255_v5 = vrot.slane %v1254_v3, 4  ;;  %v1491_v60 = vmax.f32 %v1473_v43, 0.0 }
 0x4c8   :  { %v1264_v7 = vrot.slane %v1263_v33, 4  ;;  %v1492_v55 = vmax.f32 %v1475_v18, 0.0  ;;  %v1478_v17 = vpop.f32.mrb[44].mxu0 }
 0x4c9   :  { %v1256_v31 = vadd.f32 %v1255_v5, %v1254_v3  ;;  %v2694_v13 = vadd.f32 %v1491_v60, %v1394_v32  ;;  %v1480_v9 = vpop.f32.mrb[45].mxu0  ;;  %v1479_v0 = vadd.f32 %v1478_v17, %v2143_v30 }
 0x4ca   :  { %v1265_v2 = vadd.f32 %v1264_v7, %v1263_v33  ;;  %v2700_v10 = vadd.f32 %v1492_v55, %v1395_v15  ;;  %v1481_v19 = vadd.f32 %v1480_v9, %v2143_v30 }
 0x4cb   :  { %v1257_v11 = vrot.slane %v1256_v31, 2  ;;  %v1822_v1 = vpack.c.bf16 %v2694_v13, %v1497_v59  ;;  %v1493_v16 = vmax.f32 %v1479_v0, 0.0 }
 0x4cc   :  { %v1266_v22 = vrot.slane %v1265_v2, 2  ;;  %v1484_v32 = vpop.f32.mrb[46].mxu0  ;;  %v1820_v63 = vpack.c.bf16 %v2700_v10, %v1498_v34  ;;  %v1494_v57 = vmax.f32 %v1481_v19, 0.0 }
 0x4cd   :  { %v1258_v27 = vadd.f32 %v1257_v11, %v1256_v31  ;;  %v1485_v29 = vadd.f32 %v1484_v32, %v2163_v38  ;;  %v1486_v51 = vpop.f32.mrb[47].mxu0  ;;  %v1501_v33 = vadd.f32 %v1493_v16, %v1396_v61 }
 0x4ce   :  { %v1267_v15 = vadd.f32 %v1266_v22, %v1265_v2  ;;  %v1487_v50 = vadd.f32 %v1486_v51, %v2163_v38  ;;  %1821 = vmatprep.subr.bf16.mxu1 %v1820_v63  ;;  %v1502_v43 = vadd.f32 %v1494_v57, %v1397_v12 }
 0x4cf   :  { %v1259_v23 = vrot.slane %v1258_v27, 1  ;;  %v1495_v36 = vmax.f32 %v1485_v29, 0.0  ;;  %1823 = vmatpush1.bf16.msra.mxu1 %v1822_v1 }
 0x4d0   :  { %v1268_v30 = vrot.slane %v1267_v15, 1  ;;  %v1496_v25 = vmax.f32 %v1487_v50, 0.0 }
 0x4d1   :  { %v1260_v52 = vadd.f32 %v1259_v23, %v1258_v27  ;;  %v1503_v37 = vadd.f32 %v1495_v36, %v1398_v21 }
 0x4d2   :  { %v1269_v3 = vadd.f32 %v1268_v30, %v1267_v15  ;;  %v1504_v4 = vadd.f32 %v1496_v25, %v1399_v40 }
 0x4d3   :  { %v1270_v38 = vadd.f32 %v1260_v52, %v2380_v41  ;;  %v1826_v5 = vpack.c.bf16 %v1503_v37, %v1501_v33 }
 0x4d4   :  { %v1271_v28 = vadd.f32 %v1269_v3, %v2380_v41  ;;  %v1824_v18 = vpack.c.bf16 %v1504_v4, %v1502_v43 }
 0x4d6   :  { %1825 = vmatprep.subr.bf16.mxu1 %v1824_v18  ;;  %v1274_v42 = vcombine.low %v1270_v38, %v1271_v28 }
 0x4d7   :  { %1827 = vmatpush1.bf16.msra.mxu1 %v1826_v5 }
 0x4d8   :  { %v1281_v14 = vrot.slane %v1274_v42, %v2399_v53 }
 0x4da   :  { %1736 = vmatmul.mubr.msk.f32.vlgmr.msra.gmra.mrb[40].mxu1 %vm225_vm4, %v2207_v62  ;;  %v1288_v8 = vrot.slane %v1281_v14, %v2399_v53 }
 0x4db   :  { %1575 = vmatprep.mubr.f32.mxu1 %v2802_v56 }
 0x4dc   :  { %1291 = vst.msk [vmem:[#allocation3 + $0x4] sm:$0x3] %vm2423_vm5, %v1288_v8 }
 0x4de   :  { %1737 = vmatmul.mubr.msk.f32.gmra.mrb[42].mxu1 %vm225_vm4, %v2226_v24 }
 0x4df   :  { %1581 = vmatprep.mubr.f32.mxu1 %v2802_v56 }
 0x4e2   :  { %1738 = vmatmul.mubr.msk.f32.gmra.mrb[44].mxu1 %vm225_vm4, %v2247_v48 }
 0x4e3   :  { %1587 = vmatprep.mubr.f32.mxu1 %v2802_v56 }
 0x4e6   :  { %1739 = vmatmul.mubr.msk.f32.gmra.mrb[46].mxu1 %vm225_vm4, %v2272_v46 }
 0x5ad   :  { %v1571_v62 = vpop.f32.mrb[40].mxu1 }
 0x5ae   :  { %v1572_v47 = vadd.f32 %v1571_v62, %v2311_v6  ;;  %v1573_v49 = vpop.f32.mrb[41].mxu1 }
 0x5af   :  { %v1574_v21 = vadd.f32 %v1573_v49, %v2311_v6 }
 0x5b0   :  { %v1594_v12 = vmax.f32 %v1572_v47, 0.0 }
 0x5b1   :  { %v1595_v40 = vmax.f32 %v1574_v21, 0.0  ;;  %v1577_v61 = vpop.f32.mrb[42].mxu1 }
 0x5b2   :  { %v1578_v24 = vadd.f32 %v1577_v61, %v2313_v54  ;;  %v1579_v60 = vpop.f32.mrb[43].mxu1  ;;  %v1602_v48 = vadd.f32 %v1594_v12, %v1497_v59 }
 0x5b3   :  { %v1580_v7 = vadd.f32 %v1579_v60, %v2313_v54  ;;  %v1603_v56 = vadd.f32 %v1595_v40, %v1498_v34 }
 0x5b4   :  { %v1596_v55 = vmax.f32 %v1578_v24, 0.0  ;;  %v1610_v11 = vmul.f32 %v1602_v48, %v2324_v58 }
 0x5b5   :  { %v1597_v17 = vmax.f32 %v1580_v7, 0.0  ;;  %v1583_v31 = vpop.f32.mrb[44].mxu1  ;;  %v1611_v54 = vmul.f32 %v1603_v56, %v2324_v58 }
 0x5b6   :  { %v1604_v46 = vadd.f32 %v1596_v55, %v2694_v13  ;;  %v1584_v9 = vadd.f32 %v1583_v31, %v2316_v20  ;;  %v1585_v2 = vpop.f32.mrb[45].mxu1 }
 0x5b7   :  { %v1605_v6 = vadd.f32 %v1597_v17, %v2700_v10  ;;  %v1586_v19 = vadd.f32 %v1585_v2, %v2316_v20 }
 0x5b8   :  { %v1612_v0 = vmul.f32 %v1604_v46, %v2329_v44  ;;  %v1598_v22 = vmax.f32 %v1584_v9, 0.0 }
 0x5b9   :  { %v1613_v34 = vmul.f32 %v1605_v6, %v2329_v44  ;;  %v1599_v59 = vmax.f32 %v1586_v19, 0.0  ;;  %v1589_v32 = vpop.f32.mrb[46].mxu1 }
 0x5ba   :  { %v1618_v63 = vadd.f32 %v1612_v0, %v1610_v11  ;;  %v1606_v13 = vadd.f32 %v1598_v22, %v1501_v33  ;;  %v1590_v27 = vadd.f32 %v1589_v32, %v2319_v26  ;;  %v1591_v1 = vpop.f32.mrb[47].mxu1 }
 0x5bb   :  { %v1627_v29 = vadd.f32 %v1613_v34, %v1611_v54  ;;  %v1607_v10 = vadd.f32 %v1599_v59, %v1502_v43  ;;  %v1592_v20 = vadd.f32 %v1591_v1, %v2319_v26 }
 0x5bc   :  { %v1614_v51 = vmul.f32 %v1606_v13, %v2339_v39  ;;  %v1600_v15 = vmax.f32 %v1590_v27, 0.0 }
 0x5bd   :  { %v1615_v57 = vmul.f32 %v1607_v10, %v2339_v39  ;;  %v1601_v50 = vmax.f32 %v1592_v20, 0.0 }
 0x5be   :  { %v1619_v58 = vadd.f32 %v1618_v63, %v1614_v51  ;;  %v1608_v23 = vadd.f32 %v1600_v15, %v1503_v37 }
 0x5bf   :  { %v1628_v44 = vadd.f32 %v1627_v29, %v1615_v57  ;;  %v1609_v16 = vadd.f32 %v1601_v50, %v1504_v4 }
 0x5c0   :  { %v1616_v36 = vmul.f32 %v1608_v23, %v2346_v35 }
 0x5c1   :  { %v1617_v30 = vmul.f32 %v1609_v16, %v2346_v35 }
 0x5c2   :  { %v1620_v25 = vadd.f32 %v1619_v58, %v1616_v36 }
 0x5c3   :  { %v1629_v52 = vadd.f32 %v1628_v44, %v1617_v30 }
 0x5c4   :  { %v1621_v3 = vrot.slane %v1620_v25, 4 }
 0x5c5   :  { %v1630_v43 = vrot.slane %v1629_v52, 4 }
 0x5c6   :  { %v1622_v38 = vadd.f32 %v1621_v3, %v1620_v25 }
 0x5c7   :  { %v1631_v26 = vadd.f32 %v1630_v43, %v1629_v52 }
 0x5c8   :  { %v1623_v33 = vrot.slane %v1622_v38, 2 }
 0x5c9   :  { %v1632_v28 = vrot.slane %v1631_v26, 2 }
 0x5ca   :  { %v1624_v18 = vadd.f32 %v1623_v33, %v1622_v38 }
 0x5cb   :  { %v1633_v5 = vadd.f32 %v1632_v28, %v1631_v26 }
 0x5cc   :  { %v1625_v39 = vrot.slane %v1624_v18, 1 }
 0x5cd   :  { %v1634_v42 = vrot.slane %v1633_v5, 1 }
 0x5ce   :  { %v1626_v14 = vadd.f32 %v1625_v39, %v1624_v18 }
 0x5cf   :  { %v1635_v37 = vadd.f32 %v1634_v42, %v1633_v5 }
 0x5d0   :  { %v1636_v4 = vadd.f32 %v1626_v14, %v2380_v41 }
 0x5d1   :  { %v1637_v8 = vadd.f32 %v1635_v37, %v2380_v41 }
 0x5d3   :  { %v1640_v62 = vcombine.low %v1636_v4, %v1637_v8 }
 0x5d5   :  { %v1647_v35 = vrot.slane %v1640_v62, %v2399_v53 }
 0x5d7   :  { %v1654_v47 = vrot.slane %v1647_v35, %v2399_v53 }
 0x5d9   :  { %1657 = vst.msk [vmem:[#allocation3 + $0x6] sm:$0x3] %vm2423_vm5, %v1654_v47 }
 0x5da   :  { %1846 = shalt.err (!%p1843_p4)
}
 0x5db   :  { %s1847_s6 = scalar_lea.hbm %s2780_s9, 128 }
 0x5dc   :  { %p1848_p5 = scmp.ne.s32.totalorder %s2780_s9, %s1847_s6  ;;  %p1851_p6 = scmp.lt.u32.totalorder %s1847_s6, %s2780_s9 }
 0x5de   :  { %p1853_p7 = pnand %p1851_p6, %p1848_p5 }
 0x5e0   :  { %1856 = shalt.err (!%p1853_p7)
}
 0x5e1   :  { %1667 = dma.vmem_to_hbm [thread:$0]  %s1665_s19, 128, %s2780_s9, [#allocation4]  }
 0x5e2   :  { %1857 = dma.done.wait [#allocation4], 128  }
 0x5e3   :  { %1858 = vsyncadd [#allocation4], 4294967168 }
 0x5e4   :  { %1671 = vsyncpa [#allocation4], 1 }

</bundles_post_ra>
